<compile_context>
chip_gen: v7x
topology: tpu7x:2x2x1
jax: 0.10.0
libtpu: 0.0.40
codegen_flags: <defaults>
</compile_context>

<pallas_src>
import math

import jax
import jax.numpy as jnp
from jax import lax
from jax.experimental import pallas as pl
from jax.experimental.pallas import tpu as pltpu

# ----- config (consistent with the PyTorch module, small test shapes) -----
B = 2          # batch
T = 8          # seq_len
C = 32         # d_model
N_HEAD = 4
HD = C // N_HEAD
D_FF = 128
M = B * T      # batch folded into matmul M-dim
LN_EPS = 1e-5


def _layernorm(x, w, b):
    mu = jnp.mean(x, axis=-1, keepdims=True)
    xc = x - mu
    var = jnp.mean(xc * xc, axis=-1, keepdims=True)
    return xc * lax.rsqrt(var + LN_EPS) * w + b


def _gelu_tanh(x):
    return 0.5 * x * (1.0 + jnp.tanh(math.sqrt(2.0 / math.pi)
                                     * (x + 0.044715 * x * x * x)))


def block_kernel(x_ref, wqkv_ref, bqkv_ref, wproj_ref, wfc_ref, wfc2_ref,
                 bias_ref, vec_ref, o_ref):
    x = x_ref[...]                     # (M, C) f32
    vec = vec_ref[...]                 # (8, 128) f32 packed LN/bias slab

    ln1_w = vec[0:1, :C]
    ln1_b = vec[1:2, :C]
    ln2_w = vec[2:3, :C]
    ln2_b = vec[3:4, :C]
    b_proj = vec[4:5, :C]
    b_fc = vec[5:6, :D_FF]
    b_fc2 = vec[6:7, :C]

    bias = bias_ref[...]               # (M, M) additive causal/block-diag mask

    # ---------- attention branch ----------
    h1 = _layernorm(x, ln1_w, ln1_b)                                   # (M, C)
    h1b = h1.astype(jnp.bfloat16)

    acc = jnp.zeros((M, C), jnp.float32)
    for h in range(N_HEAD):            # static unroll over heads
        # per-head weights/biases: leading-axis indexing only (no lane slices)
        wq = wqkv_ref[3 * h + 0]                       # (C, HD) bf16, scale folded
        wk = wqkv_ref[3 * h + 1]
        wv = wqkv_ref[3 * h + 2]
        bq = bqkv_ref[3 * h + 0:3 * h + 1, :]          # (1, HD) f32, scale folded
        bk = bqkv_ref[3 * h + 1:3 * h + 2, :]
        bv = bqkv_ref[3 * h + 2:3 * h + 3, :]

        q = jnp.dot(h1b, wq, preferred_element_type=jnp.float32) + bq  # (M, HD)
        k = jnp.dot(h1b, wk, preferred_element_type=jnp.float32) + bk
        v = jnp.dot(h1b, wv, preferred_element_type=jnp.float32) + bv

        # scores: contract head dims; scale already folded into wq/bq
        s = lax.dot_general(q, k, (((1,), (1,)), ((), ())),
                            preferred_element_type=jnp.float32) + bias  # (M, M)
        s = s - jnp.max(s, axis=-1, keepdims=True)
        p = jnp.exp(s)
        p = p * pl.reciprocal(jnp.sum(p, axis=-1, keepdims=True), approx=False)

        y = jnp.dot(p, v, preferred_element_type=jnp.float32)           # (M, HD)
        # fold the head concat into the projection: Wproj row slice = sublane
        wp = wproj_ref[h * HD:(h + 1) * HD, :]                          # (HD, C)
        acc = acc + jnp.dot(y.astype(jnp.bfloat16), wp,
                            preferred_element_type=jnp.float32)

    x1 = x + acc + b_proj                                               # res 1

    # ---------- MLP branch ----------
    h2 = _layernorm(x1, ln2_w, ln2_b)
    ff = jnp.dot(h2.astype(jnp.bfloat16), wfc_ref[...],
                 preferred_element_type=jnp.float32) + b_fc             # (M, D_FF)
    ff = _gelu_tanh(ff)
    mlp_out = jnp.dot(ff.astype(jnp.bfloat16), wfc2_ref[...],
                      preferred_element_type=jnp.float32) + b_fc2
    # TODO(synk): when M is tiled up, present a lane-dense (M*C/128, 128)
    # out_spec; at (16, 32) the in-kernel repack costs more than it saves.
    o_ref[...] = x1 + mlp_out                                           # res 2


def transformer_block(x, params):
    (ln1_w, ln1_b, wqkv, bqkv, wproj, bproj,
     ln2_w, ln2_b, wfc, bfc, wfc2, bfc2) = params

    # batch folded into M-dim (pure row-major reshape, done outside the kernel)
    x2d = x.reshape(M, C)

    # ---- wrapper-side constant folding & head-major repack (free at trace) ----
    scale = 1.0 / math.sqrt(HD)
    bqkv_f = bqkv.reshape(-1)
    wq_all = wqkv[:, 0:C] * scale          # fold 1/sqrt(HD) into q weights/bias
    wk_all = wqkv[:, C:2 * C]
    wv_all = wqkv[:, 2 * C:3 * C]
    bq_all = bqkv_f[0:C] * scale
    bk_all = bqkv_f[C:2 * C]
    bv_all = bqkv_f[2 * C:3 * C]

    w_slices, b_slices = [], []
    for h in range(N_HEAD):
        sl = slice(h * HD, (h + 1) * HD)
        w_slices += [wq_all[:, sl], wk_all[:, sl], wv_all[:, sl]]
        b_slices += [bq_all[sl], bk_all[sl], bv_all[sl]]
    wqkv_stack = jnp.stack(w_slices, axis=0).astype(jnp.bfloat16)   # (12, C, HD)
    bqkv_stack = jnp.stack(b_slices, axis=0).astype(jnp.float32)    # (12, HD)

    # bf16 MXU operands (halves weight DMA bytes; f32 accumulation in-kernel)
    wproj_b = wproj.astype(jnp.bfloat16)
    wfc_b = wfc.astype(jnp.bfloat16)
    wfc2_b = wfc2.astype(jnp.bfloat16)

    # causal + same-batch (block-diagonal) additive mask: compile-time constant
    row = jnp.arange(M)[:, None]
    col = jnp.arange(M)[None, :]
    ok = ((row // T) == (col // T)) & ((col % T) <= (row % T))
    bias_mat = jnp.where(ok, 0.0, -1e30).astype(jnp.float32)

    # pack the remaining small vectors into one lane-dense (8, 128) f32 slab
    vec = jnp.zeros((8, 128), jnp.float32)
    vec = vec.at[0, :C].set(ln1_w.reshape(-1))
    vec = vec.at[1, :C].set(ln1_b.reshape(-1))
    vec = vec.at[2, :C].set(ln2_w.reshape(-1))
    vec = vec.at[3, :C].set(ln2_b.reshape(-1))
    vec = vec.at[4, :C].set(bproj.reshape(-1))
    vec = vec.at[5, :D_FF].set(bfc.reshape(-1))
    vec = vec.at[6, :C].set(bfc2.reshape(-1))

    grid_spec = pltpu.PrefetchScalarGridSpec(
        num_scalar_prefetch=0,
        grid=(1,),                                   # single step: whole problem in VMEM
        in_specs=[
            pl.BlockSpec((M, C), lambda i: (0, 0)),                 # x (B*T, C)
            pl.BlockSpec((3 * N_HEAD, C, HD), lambda i: (0, 0, 0)), # qkv weight stack
            pl.BlockSpec((3 * N_HEAD, HD), lambda i: (0, 0)),       # qkv bias stack
            pl.BlockSpec((C, C), lambda i: (0, 0)),                 # Wproj (bf16)
            pl.BlockSpec((C, D_FF), lambda i: (0, 0)),              # Wfc (bf16)
            pl.BlockSpec((D_FF, C), lambda i: (0, 0)),              # Wfc2 (bf16)
            pl.BlockSpec((M, M), lambda i: (0, 0)),                 # additive mask
            pl.BlockSpec((8, 128), lambda i: (0, 0)),               # LN/bias slab
        ],
        out_specs=pl.BlockSpec((M, C), lambda i: (0, 0)),
    )

    mm_flops = (N_HEAD * (3 * 2 * M * C * HD + 2 * M * HD * M
                          + 2 * M * M * HD + 2 * M * HD * C)
                + 2 * M * C * D_FF + 2 * M * D_FF * C)
    cost = pl.CostEstimate(
        flops=mm_flops,
        transcendentals=N_HEAD * (M * M + M) + M * D_FF + 2 * M,
        bytes_accessed=(2 * M * C * 4 + 8 * 128 * 4 + M * M * 4
                        + 3 * N_HEAD * HD * 4
                        + 2 * (3 * N_HEAD * C * HD + C * C
                               + C * D_FF + D_FF * C)),
    )

    out2d = pl.pallas_call(
        block_kernel,
        out_shape=jax.ShapeDtypeStruct((M, C), jnp.float32),
        grid_spec=grid_spec,
        compiler_params=pltpu.CompilerParams(
            dimension_semantics=("parallel",)),      # M-tiles would shard across TCs
        cost_estimate=cost,
    )(x2d, wqkv_stack, bqkv_stack, wproj_b, wfc_b, wfc2_b, bias_mat, vec)

    return out2d.reshape(B, T, C)


# ---------------- pure-JAX f32 reference (correctness check) ----------------
def reference_block(x, params):
    (ln1_w, ln1_b, wqkv, bqkv, wproj, bproj,
     ln2_w, ln2_b, wfc, bfc, wfc2, bfc2) = params

    def ln(z, w, b):
        mu = jnp.mean(z, -1, keepdims=True)
        var = jnp.mean((z - mu) ** 2, -1, keepdims=True)
        return (z - mu) / jnp.sqrt(var + LN_EPS) * w[0] + b[0]

    h1 = ln(x, ln1_w, ln1_b)
    qkv = h1 @ wqkv + bqkv[0]
    q, k, v = jnp.split(qkv, 3, axis=-1)
    q = q.reshape(B, T, N_HEAD, HD).transpose(0, 2, 1, 3)
    k = k.reshape(B, T, N_HEAD, HD).transpose(0, 2, 1, 3)
    v = v.reshape(B, T, N_HEAD, HD).transpose(0, 2, 1, 3)
    att = jnp.einsum("bhqd,bhkd->bhqk", q, k) / math.sqrt(HD)
    mask = jnp.tril(jnp.ones((T, T), bool))
    att = jnp.where(mask, att, -jnp.inf)
    att = jax.nn.softmax(att, axis=-1)
    y = jnp.einsum("bhqk,bhkd->bhqd", att, v)
    y = y.transpose(0, 2, 1, 3).reshape(B, T, C)
    x1 = x + (y @ wproj + bproj[0])

    h2 = ln(x1, ln2_w, ln2_b)
    ff = h2 @ wfc + bfc[0]
    ff = 0.5 * ff * (1.0 + jnp.tanh(math.sqrt(2 / math.pi)
                                    * (ff + 0.044715 * ff ** 3)))
    return x1 + (ff @ wfc2 + bfc2[0])


def make_params(key):
    keys = jax.random.split(key, 8)
    s = 0.02
    ln1_w = jnp.ones((1, C), jnp.float32)
    ln1_b = jnp.zeros((1, C), jnp.float32)
    ln2_w = jnp.ones((1, C), jnp.float32)
    ln2_b = jnp.zeros((1, C), jnp.float32)
    wqkv = s * jax.random.normal(keys[0], (C, 3 * C), jnp.float32)
    bqkv = 0.01 * jax.random.normal(keys[4], (1, 3 * C), jnp.float32)
    wproj = s * jax.random.normal(keys[1], (C, C), jnp.float32)
    bproj = 0.01 * jax.random.normal(keys[5], (1, C), jnp.float32)
    wfc = s * jax.random.normal(keys[2], (C, D_FF), jnp.float32)
    bfc = 0.01 * jax.random.normal(keys[6], (1, D_FF), jnp.float32)
    wfc2 = s * jax.random.normal(keys[3], (D_FF, C), jnp.float32)
    bfc2 = 0.01 * jax.random.normal(keys[7], (1, C), jnp.float32)
    return (ln1_w, ln1_b, wqkv, bqkv, wproj, bproj,
            ln2_w, ln2_b, wfc, bfc, wfc2, bfc2)


if __name__ == "__main__":
    key = jax.random.PRNGKey(0)
    kx, kp = jax.random.split(key)
    x = jax.random.normal(kx, (B, T, C), jnp.float32)
    params = make_params(kp)

    out = jax.block_until_ready(transformer_block(x, params))
    ref = reference_block(x, params)

    assert out.shape == (B, T, C)
    err = float(jnp.max(jnp.abs(out - ref)))
    assert err < 5e-3, f"max abs diff vs reference = {err}"
    print("KERNEL_OK")
</pallas_src>

<mosaic_0001>
module attributes {stable_mosaic.version = 11 : i64} {
  func.func @block_kernel(%arg0: i32, %arg1: memref<16x32xf32, #tpu.memory_space<vmem>>, %arg2: memref<12x32x8xbf16, #tpu.memory_space<vmem>>, %arg3: memref<12x8xf32, #tpu.memory_space<vmem>>, %arg4: memref<32x32xbf16, #tpu.memory_space<vmem>>, %arg5: memref<32x128xbf16, #tpu.memory_space<vmem>>, %arg6: memref<128x32xbf16, #tpu.memory_space<vmem>>, %arg7: memref<16x16xf32, #tpu.memory_space<vmem>>, %arg8: memref<8x128xf32, #tpu.memory_space<vmem>>, %arg9: memref<16x32xf32, #tpu.memory_space<vmem>>) attributes {dimension_semantics = [#tpu.dimension_semantics<parallel>], iteration_bounds = array<i64: 1>, scalar_prefetch = 0 : i64, scratch_operands = 0 : i64, tpu.core_type = #tpu.core_type<tc>, window_params = [{pipeline_mode = #tpu.pipeline_mode<synchronous>, transform_indices = @transform_0, window_bounds = array<i64: 16, 32>}, {pipeline_mode = #tpu.pipeline_mode<synchronous>, transform_indices = @transform_1, window_bounds = array<i64: 12, 32, 8>}, {pipeline_mode = #tpu.pipeline_mode<synchronous>, transform_indices = @transform_2, window_bounds = array<i64: 12, 8>}, {pipeline_mode = #tpu.pipeline_mode<synchronous>, transform_indices = @transform_3, window_bounds = array<i64: 32, 32>}, {pipeline_mode = #tpu.pipeline_mode<synchronous>, transform_indices = @transform_4, window_bounds = array<i64: 32, 128>}, {pipeline_mode = #tpu.pipeline_mode<synchronous>, transform_indices = @transform_5, window_bounds = array<i64: 128, 32>}, {pipeline_mode = #tpu.pipeline_mode<synchronous>, transform_indices = @transform_6, window_bounds = array<i64: 16, 16>}, {pipeline_mode = #tpu.pipeline_mode<synchronous>, transform_indices = @transform_7, window_bounds = array<i64: 8, 128>}, {pipeline_mode = #tpu.pipeline_mode<synchronous>, transform_indices = @transform_8, window_bounds = array<i64: 16, 32>}]} {
    %c0 = arith.constant 0 : index
    %c0_0 = arith.constant 0 : index
    %0 = vector.load %arg1[%c0, %c0_0] : memref<16x32xf32, #tpu.memory_space<vmem>>, vector<16x32xf32>
    %c0_1 = arith.constant 0 : index
    %c0_2 = arith.constant 0 : index
    %1 = vector.load %arg8[%c0_1, %c0_2] : memref<8x128xf32, #tpu.memory_space<vmem>>, vector<8x128xf32>
    %2 = vector.extract_strided_slice %1 {offsets = [0, 0], sizes = [1, 32], strides = [1, 1]} : vector<8x128xf32> to vector<1x32xf32>
    %3 = vector.extract_strided_slice %1 {offsets = [1, 0], sizes = [1, 32], strides = [1, 1]} : vector<8x128xf32> to vector<1x32xf32>
    %4 = vector.extract_strided_slice %1 {offsets = [2, 0], sizes = [1, 32], strides = [1, 1]} : vector<8x128xf32> to vector<1x32xf32>
    %5 = vector.extract_strided_slice %1 {offsets = [3, 0], sizes = [1, 32], strides = [1, 1]} : vector<8x128xf32> to vector<1x32xf32>
    %6 = vector.extract_strided_slice %1 {offsets = [4, 0], sizes = [1, 32], strides = [1, 1]} : vector<8x128xf32> to vector<1x32xf32>
    %7 = vector.extract_strided_slice %1 {offsets = [5, 0], sizes = [1, 128], strides = [1, 1]} : vector<8x128xf32> to vector<1x128xf32>
    %8 = vector.extract_strided_slice %1 {offsets = [6, 0], sizes = [1, 32], strides = [1, 1]} : vector<8x128xf32> to vector<1x32xf32>
    %c0_3 = arith.constant 0 : index
    %c0_4 = arith.constant 0 : index
    %9 = vector.load %arg7[%c0_3, %c0_4] : memref<16x16xf32, #tpu.memory_space<vmem>>, vector<16x16xf32>
    %cst = arith.constant dense<0.000000e+00> : vector<16xf32>
    %10 = vector.multi_reduction <add>, %0, %cst [1] : vector<16x32xf32> to vector<16xf32>
    %11 = vector.shape_cast %10 : vector<16xf32> to vector<16x1xf32>
    %cst_5 = arith.constant 3.200000e+01 : f32
    %12 = vector.broadcast %cst_5 : f32 to vector<16x1xf32>
    %13 = arith.divf %11, %12 : vector<16x1xf32>
    %14 = vector.broadcast %13 : vector<16x1xf32> to vector<16x32xf32>
    %15 = arith.subf %0, %14 : vector<16x32xf32>
    %16 = arith.mulf %15, %15 : vector<16x32xf32>
    %cst_6 = arith.constant dense<0.000000e+00> : vector<16xf32>
    %17 = vector.multi_reduction <add>, %16, %cst_6 [1] : vector<16x32xf32> to vector<16xf32>
    %18 = vector.shape_cast %17 : vector<16xf32> to vector<16x1xf32>
    %cst_7 = arith.constant 3.200000e+01 : f32
    %19 = vector.broadcast %cst_7 : f32 to vector<16x1xf32>
    %20 = arith.divf %18, %19 : vector<16x1xf32>
    %cst_8 = arith.constant 9.99999974E-6 : f32
    %21 = vector.broadcast %cst_8 : f32 to vector<16x1xf32>
    %22 = arith.addf %20, %21 : vector<16x1xf32>
    %23 = math.rsqrt %22 : vector<16x1xf32>
    %24 = vector.broadcast %23 : vector<16x1xf32> to vector<16x32xf32>
    %25 = arith.mulf %15, %24 : vector<16x32xf32>
    %26 = vector.broadcast %2 : vector<1x32xf32> to vector<16x32xf32>
    %27 = arith.mulf %25, %26 : vector<16x32xf32>
    %28 = vector.broadcast %3 : vector<1x32xf32> to vector<16x32xf32>
    %29 = arith.addf %27, %28 : vector<16x32xf32>
    %30 = arith.truncf %29 : vector<16x32xf32> to vector<16x32xbf16>
    %cst_9 = arith.constant 0.000000e+00 : f32
    %31 = vector.broadcast %cst_9 : f32 to vector<16x32xf32>
    %c0_10 = arith.constant 0 : index
    %c0_11 = arith.constant 0 : index
    %c0_12 = arith.constant 0 : index
    %32 = vector.load %arg2[%c0_10, %c0_11, %c0_12] : memref<12x32x8xbf16, #tpu.memory_space<vmem>>, vector<1x32x8xbf16>
    %33 = vector.shape_cast %32 : vector<1x32x8xbf16> to vector<32x8xbf16>
    %c1 = arith.constant 1 : index
    %c0_13 = arith.constant 0 : index
    %c0_14 = arith.constant 0 : index
    %34 = vector.load %arg2[%c1, %c0_13, %c0_14] : memref<12x32x8xbf16, #tpu.memory_space<vmem>>, vector<1x32x8xbf16>
    %35 = vector.shape_cast %34 : vector<1x32x8xbf16> to vector<32x8xbf16>
    %c2 = arith.constant 2 : index
    %c0_15 = arith.constant 0 : index
    %c0_16 = arith.constant 0 : index
    %36 = vector.load %arg2[%c2, %c0_15, %c0_16] : memref<12x32x8xbf16, #tpu.memory_space<vmem>>, vector<1x32x8xbf16>
    %37 = vector.shape_cast %36 : vector<1x32x8xbf16> to vector<32x8xbf16>
    %c0_17 = arith.constant 0 : index
    %c0_18 = arith.constant 0 : index
    %38 = vector.load %arg3[%c0_17, %c0_18] : memref<12x8xf32, #tpu.memory_space<vmem>>, vector<1x8xf32>
    %c1_19 = arith.constant 1 : index
    %c0_20 = arith.constant 0 : index
    %39 = vector.load %arg3[%c1_19, %c0_20] : memref<12x8xf32, #tpu.memory_space<vmem>>, vector<1x8xf32>
    %c2_21 = arith.constant 2 : index
    %c0_22 = arith.constant 0 : index
    %40 = vector.load %arg3[%c2_21, %c0_22] : memref<12x8xf32, #tpu.memory_space<vmem>>, vector<1x8xf32>
    %cst_23 = arith.constant dense<0.000000e+00> : vector<16x8xf32>
    %41 = tpu.matmul %30, %33, %cst_23 {dimension_numbers = #tpu.dot_dimension_numbers<[1], [0], [0], [1], [0, 0, 1, 1], [], []>} : vector<16x32xbf16>, vector<32x8xbf16>, vector<16x8xf32> -> vector<16x8xf32>
    %42 = vector.broadcast %38 : vector<1x8xf32> to vector<16x8xf32>
    %43 = arith.addf %41, %42 : vector<16x8xf32>
    %cst_24 = arith.constant dense<0.000000e+00> : vector<16x8xf32>
    %44 = tpu.matmul %30, %35, %cst_24 {dimension_numbers = #tpu.dot_dimension_numbers<[1], [0], [0], [1], [0, 0, 1, 1], [], []>} : vector<16x32xbf16>, vector<32x8xbf16>, vector<16x8xf32> -> vector<16x8xf32>
    %45 = vector.broadcast %39 : vector<1x8xf32> to vector<16x8xf32>
    %46 = arith.addf %44, %45 : vector<16x8xf32>
    %cst_25 = arith.constant dense<0.000000e+00> : vector<16x8xf32>
    %47 = tpu.matmul %30, %37, %cst_25 {dimension_numbers = #tpu.dot_dimension_numbers<[1], [0], [0], [1], [0, 0, 1, 1], [], []>} : vector<16x32xbf16>, vector<32x8xbf16>, vector<16x8xf32> -> vector<16x8xf32>
    %48 = vector.broadcast %40 : vector<1x8xf32> to vector<16x8xf32>
    %49 = arith.addf %47, %48 : vector<16x8xf32>
    %cst_26 = arith.constant dense<0.000000e+00> : vector<16x16xf32>
    %50 = tpu.matmul %43, %46, %cst_26 {dimension_numbers = #tpu.dot_dimension_numbers<[1], [1], [0], [0], [0, 0, 1, 0], [], []>} : vector<16x8xf32>, vector<16x8xf32>, vector<16x16xf32> -> vector<16x16xf32>
    %51 = arith.addf %50, %9 : vector<16x16xf32>
    %cst_27 = arith.constant dense<0xFF800000> : vector<16xf32>
    %52 = vector.multi_reduction <maximumf>, %51, %cst_27 [1] : vector<16x16xf32> to vector<16xf32>
    %53 = vector.shape_cast %52 : vector<16xf32> to vector<16x1xf32>
    %54 = vector.broadcast %53 : vector<16x1xf32> to vector<16x16xf32>
    %55 = arith.subf %51, %54 : vector<16x16xf32>
    %56 = math.exp %55 : vector<16x16xf32>
    %cst_28 = arith.constant dense<0.000000e+00> : vector<16xf32>
    %57 = vector.multi_reduction <add>, %56, %cst_28 [1] : vector<16x16xf32> to vector<16xf32>
    %58 = vector.shape_cast %57 : vector<16xf32> to vector<16x1xf32>
    %59 = tpu.reciprocal %58 : vector<16x1xf32> -> vector<16x1xf32>
    %60 = vector.broadcast %59 : vector<16x1xf32> to vector<16x16xf32>
    %61 = arith.mulf %56, %60 : vector<16x16xf32>
    %cst_29 = arith.constant dense<0.000000e+00> : vector<16x8xf32>
    %62 = tpu.matmul %61, %49, %cst_29 {dimension_numbers = #tpu.dot_dimension_numbers<[1], [0], [0], [1], [0, 0, 1, 1], [], []>} : vector<16x16xf32>, vector<16x8xf32>, vector<16x8xf32> -> vector<16x8xf32>
    %c0_30 = arith.constant 0 : index
    %c0_31 = arith.constant 0 : index
    %63 = vector.load %arg4[%c0_30, %c0_31] : memref<32x32xbf16, #tpu.memory_space<vmem>>, vector<8x32xbf16>
    %64 = arith.truncf %62 : vector<16x8xf32> to vector<16x8xbf16>
    %cst_32 = arith.constant dense<0.000000e+00> : vector<16x32xf32>
    %65 = tpu.matmul %64, %63, %cst_32 {dimension_numbers = #tpu.dot_dimension_numbers<[1], [0], [0], [1], [0, 0, 1, 1], [], []>} : vector<16x8xbf16>, vector<8x32xbf16>, vector<16x32xf32> -> vector<16x32xf32>
    %66 = arith.addf %31, %65 : vector<16x32xf32>
    %c3 = arith.constant 3 : index
    %c0_33 = arith.constant 0 : index
    %c0_34 = arith.constant 0 : index
    %67 = vector.load %arg2[%c3, %c0_33, %c0_34] : memref<12x32x8xbf16, #tpu.memory_space<vmem>>, vector<1x32x8xbf16>
    %68 = vector.shape_cast %67 : vector<1x32x8xbf16> to vector<32x8xbf16>
    %c4 = arith.constant 4 : index
    %c0_35 = arith.constant 0 : index
    %c0_36 = arith.constant 0 : index
    %69 = vector.load %arg2[%c4, %c0_35, %c0_36] : memref<12x32x8xbf16, #tpu.memory_space<vmem>>, vector<1x32x8xbf16>
    %70 = vector.shape_cast %69 : vector<1x32x8xbf16> to vector<32x8xbf16>
    %c5 = arith.constant 5 : index
    %c0_37 = arith.constant 0 : index
    %c0_38 = arith.constant 0 : index
    %71 = vector.load %arg2[%c5, %c0_37, %c0_38] : memref<12x32x8xbf16, #tpu.memory_space<vmem>>, vector<1x32x8xbf16>
    %72 = vector.shape_cast %71 : vector<1x32x8xbf16> to vector<32x8xbf16>
    %c3_39 = arith.constant 3 : index
    %c0_40 = arith.constant 0 : index
    %73 = vector.load %arg3[%c3_39, %c0_40] : memref<12x8xf32, #tpu.memory_space<vmem>>, vector<1x8xf32>
    %c4_41 = arith.constant 4 : index
    %c0_42 = arith.constant 0 : index
    %74 = vector.load %arg3[%c4_41, %c0_42] : memref<12x8xf32, #tpu.memory_space<vmem>>, vector<1x8xf32>
    %c5_43 = arith.constant 5 : index
    %c0_44 = arith.constant 0 : index
    %75 = vector.load %arg3[%c5_43, %c0_44] : memref<12x8xf32, #tpu.memory_space<vmem>>, vector<1x8xf32>
    %cst_45 = arith.constant dense<0.000000e+00> : vector<16x8xf32>
    %76 = tpu.matmul %30, %68, %cst_45 {dimension_numbers = #tpu.dot_dimension_numbers<[1], [0], [0], [1], [0, 0, 1, 1], [], []>} : vector<16x32xbf16>, vector<32x8xbf16>, vector<16x8xf32> -> vector<16x8xf32>
    %77 = vector.broadcast %73 : vector<1x8xf32> to vector<16x8xf32>
    %78 = arith.addf %76, %77 : vector<16x8xf32>
    %cst_46 = arith.constant dense<0.000000e+00> : vector<16x8xf32>
    %79 = tpu.matmul %30, %70, %cst_46 {dimension_numbers = #tpu.dot_dimension_numbers<[1], [0], [0], [1], [0, 0, 1, 1], [], []>} : vector<16x32xbf16>, vector<32x8xbf16>, vector<16x8xf32> -> vector<16x8xf32>
    %80 = vector.broadcast %74 : vector<1x8xf32> to vector<16x8xf32>
    %81 = arith.addf %79, %80 : vector<16x8xf32>
    %cst_47 = arith.constant dense<0.000000e+00> : vector<16x8xf32>
    %82 = tpu.matmul %30, %72, %cst_47 {dimension_numbers = #tpu.dot_dimension_numbers<[1], [0], [0], [1], [0, 0, 1, 1], [], []>} : vector<16x32xbf16>, vector<32x8xbf16>, vector<16x8xf32> -> vector<16x8xf32>
    %83 = vector.broadcast %75 : vector<1x8xf32> to vector<16x8xf32>
    %84 = arith.addf %82, %83 : vector<16x8xf32>
    %cst_48 = arith.constant dense<0.000000e+00> : vector<16x16xf32>
    %85 = tpu.matmul %78, %81, %cst_48 {dimension_numbers = #tpu.dot_dimension_numbers<[1], [1], [0], [0], [0, 0, 1, 0], [], []>} : vector<16x8xf32>, vector<16x8xf32>, vector<16x16xf32> -> vector<16x16xf32>
    %86 = arith.addf %85, %9 : vector<16x16xf32>
    %cst_49 = arith.constant dense<0xFF800000> : vector<16xf32>
    %87 = vector.multi_reduction <maximumf>, %86, %cst_49 [1] : vector<16x16xf32> to vector<16xf32>
    %88 = vector.shape_cast %87 : vector<16xf32> to vector<16x1xf32>
    %89 = vector.broadcast %88 : vector<16x1xf32> to vector<16x16xf32>
    %90 = arith.subf %86, %89 : vector<16x16xf32>
    %91 = math.exp %90 : vector<16x16xf32>
    %cst_50 = arith.constant dense<0.000000e+00> : vector<16xf32>
    %92 = vector.multi_reduction <add>, %91, %cst_50 [1] : vector<16x16xf32> to vector<16xf32>
    %93 = vector.shape_cast %92 : vector<16xf32> to vector<16x1xf32>
    %94 = tpu.reciprocal %93 : vector<16x1xf32> -> vector<16x1xf32>
    %95 = vector.broadcast %94 : vector<16x1xf32> to vector<16x16xf32>
    %96 = arith.mulf %91, %95 : vector<16x16xf32>
    %cst_51 = arith.constant dense<0.000000e+00> : vector<16x8xf32>
    %97 = tpu.matmul %96, %84, %cst_51 {dimension_numbers = #tpu.dot_dimension_numbers<[1], [0], [0], [1], [0, 0, 1, 1], [], []>} : vector<16x16xf32>, vector<16x8xf32>, vector<16x8xf32> -> vector<16x8xf32>
    %c8 = arith.constant 8 : index
    %c0_52 = arith.constant 0 : index
    %98 = vector.load %arg4[%c8, %c0_52] : memref<32x32xbf16, #tpu.memory_space<vmem>>, vector<8x32xbf16>
    %99 = arith.truncf %97 : vector<16x8xf32> to vector<16x8xbf16>
    %cst_53 = arith.constant dense<0.000000e+00> : vector<16x32xf32>
    %100 = tpu.matmul %99, %98, %cst_53 {dimension_numbers = #tpu.dot_dimension_numbers<[1], [0], [0], [1], [0, 0, 1, 1], [], []>} : vector<16x8xbf16>, vector<8x32xbf16>, vector<16x32xf32> -> vector<16x32xf32>
    %101 = arith.addf %66, %100 : vector<16x32xf32>
    %c6 = arith.constant 6 : index
    %c0_54 = arith.constant 0 : index
    %c0_55 = arith.constant 0 : index
    %102 = vector.load %arg2[%c6, %c0_54, %c0_55] : memref<12x32x8xbf16, #tpu.memory_space<vmem>>, vector<1x32x8xbf16>
    %103 = vector.shape_cast %102 : vector<1x32x8xbf16> to vector<32x8xbf16>
    %c7 = arith.constant 7 : index
    %c0_56 = arith.constant 0 : index
    %c0_57 = arith.constant 0 : index
    %104 = vector.load %arg2[%c7, %c0_56, %c0_57] : memref<12x32x8xbf16, #tpu.memory_space<vmem>>, vector<1x32x8xbf16>
    %105 = vector.shape_cast %104 : vector<1x32x8xbf16> to vector<32x8xbf16>
    %c8_58 = arith.constant 8 : index
    %c0_59 = arith.constant 0 : index
    %c0_60 = arith.constant 0 : index
    %106 = vector.load %arg2[%c8_58, %c0_59, %c0_60] : memref<12x32x8xbf16, #tpu.memory_space<vmem>>, vector<1x32x8xbf16>
    %107 = vector.shape_cast %106 : vector<1x32x8xbf16> to vector<32x8xbf16>
    %c6_61 = arith.constant 6 : index
    %c0_62 = arith.constant 0 : index
    %108 = vector.load %arg3[%c6_61, %c0_62] : memref<12x8xf32, #tpu.memory_space<vmem>>, vector<1x8xf32>
    %c7_63 = arith.constant 7 : index
    %c0_64 = arith.constant 0 : index
    %109 = vector.load %arg3[%c7_63, %c0_64] : memref<12x8xf32, #tpu.memory_space<vmem>>, vector<1x8xf32>
    %c8_65 = arith.constant 8 : index
    %c0_66 = arith.constant 0 : index
    %110 = vector.load %arg3[%c8_65, %c0_66] : memref<12x8xf32, #tpu.memory_space<vmem>>, vector<1x8xf32>
    %cst_67 = arith.constant dense<0.000000e+00> : vector<16x8xf32>
    %111 = tpu.matmul %30, %103, %cst_67 {dimension_numbers = #tpu.dot_dimension_numbers<[1], [0], [0], [1], [0, 0, 1, 1], [], []>} : vector<16x32xbf16>, vector<32x8xbf16>, vector<16x8xf32> -> vector<16x8xf32>
    %112 = vector.broadcast %108 : vector<1x8xf32> to vector<16x8xf32>
    %113 = arith.addf %111, %112 : vector<16x8xf32>
    %cst_68 = arith.constant dense<0.000000e+00> : vector<16x8xf32>
    %114 = tpu.matmul %30, %105, %cst_68 {dimension_numbers = #tpu.dot_dimension_numbers<[1], [0], [0], [1], [0, 0, 1, 1], [], []>} : vector<16x32xbf16>, vector<32x8xbf16>, vector<16x8xf32> -> vector<16x8xf32>
    %115 = vector.broadcast %109 : vector<1x8xf32> to vector<16x8xf32>
    %116 = arith.addf %114, %115 : vector<16x8xf32>
    %cst_69 = arith.constant dense<0.000000e+00> : vector<16x8xf32>
    %117 = tpu.matmul %30, %107, %cst_69 {dimension_numbers = #tpu.dot_dimension_numbers<[1], [0], [0], [1], [0, 0, 1, 1], [], []>} : vector<16x32xbf16>, vector<32x8xbf16>, vector<16x8xf32> -> vector<16x8xf32>
    %118 = vector.broadcast %110 : vector<1x8xf32> to vector<16x8xf32>
    %119 = arith.addf %117, %118 : vector<16x8xf32>
    %cst_70 = arith.constant dense<0.000000e+00> : vector<16x16xf32>
    %120 = tpu.matmul %113, %116, %cst_70 {dimension_numbers = #tpu.dot_dimension_numbers<[1], [1], [0], [0], [0, 0, 1, 0], [], []>} : vector<16x8xf32>, vector<16x8xf32>, vector<16x16xf32> -> vector<16x16xf32>
    %121 = arith.addf %120, %9 : vector<16x16xf32>
    %cst_71 = arith.constant dense<0xFF800000> : vector<16xf32>
    %122 = vector.multi_reduction <maximumf>, %121, %cst_71 [1] : vector<16x16xf32> to vector<16xf32>
    %123 = vector.shape_cast %122 : vector<16xf32> to vector<16x1xf32>
    %124 = vector.broadcast %123 : vector<16x1xf32> to vector<16x16xf32>
    %125 = arith.subf %121, %124 : vector<16x16xf32>
    %126 = math.exp %125 : vector<16x16xf32>
    %cst_72 = arith.constant dense<0.000000e+00> : vector<16xf32>
    %127 = vector.multi_reduction <add>, %126, %cst_72 [1] : vector<16x16xf32> to vector<16xf32>
    %128 = vector.shape_cast %127 : vector<16xf32> to vector<16x1xf32>
    %129 = tpu.reciprocal %128 : vector<16x1xf32> -> vector<16x1xf32>
    %130 = vector.broadcast %129 : vector<16x1xf32> to vector<16x16xf32>
    %131 = arith.mulf %126, %130 : vector<16x16xf32>
    %cst_73 = arith.constant dense<0.000000e+00> : vector<16x8xf32>
    %132 = tpu.matmul %131, %119, %cst_73 {dimension_numbers = #tpu.dot_dimension_numbers<[1], [0], [0], [1], [0, 0, 1, 1], [], []>} : vector<16x16xf32>, vector<16x8xf32>, vector<16x8xf32> -> vector<16x8xf32>
    %c16 = arith.constant 16 : index
    %c0_74 = arith.constant 0 : index
    %133 = vector.load %arg4[%c16, %c0_74] : memref<32x32xbf16, #tpu.memory_space<vmem>>, vector<8x32xbf16>
    %134 = arith.truncf %132 : vector<16x8xf32> to vector<16x8xbf16>
    %cst_75 = arith.constant dense<0.000000e+00> : vector<16x32xf32>
    %135 = tpu.matmul %134, %133, %cst_75 {dimension_numbers = #tpu.dot_dimension_numbers<[1], [0], [0], [1], [0, 0, 1, 1], [], []>} : vector<16x8xbf16>, vector<8x32xbf16>, vector<16x32xf32> -> vector<16x32xf32>
    %136 = arith.addf %101, %135 : vector<16x32xf32>
    %c9 = arith.constant 9 : index
    %c0_76 = arith.constant 0 : index
    %c0_77 = arith.constant 0 : index
    %137 = vector.load %arg2[%c9, %c0_76, %c0_77] : memref<12x32x8xbf16, #tpu.memory_space<vmem>>, vector<1x32x8xbf16>
    %138 = vector.shape_cast %137 : vector<1x32x8xbf16> to vector<32x8xbf16>
    %c10 = arith.constant 10 : index
    %c0_78 = arith.constant 0 : index
    %c0_79 = arith.constant 0 : index
    %139 = vector.load %arg2[%c10, %c0_78, %c0_79] : memref<12x32x8xbf16, #tpu.memory_space<vmem>>, vector<1x32x8xbf16>
    %140 = vector.shape_cast %139 : vector<1x32x8xbf16> to vector<32x8xbf16>
    %c11 = arith.constant 11 : index
    %c0_80 = arith.constant 0 : index
    %c0_81 = arith.constant 0 : index
    %141 = vector.load %arg2[%c11, %c0_80, %c0_81] : memref<12x32x8xbf16, #tpu.memory_space<vmem>>, vector<1x32x8xbf16>
    %142 = vector.shape_cast %141 : vector<1x32x8xbf16> to vector<32x8xbf16>
    %c9_82 = arith.constant 9 : index
    %c0_83 = arith.constant 0 : index
    %143 = vector.load %arg3[%c9_82, %c0_83] : memref<12x8xf32, #tpu.memory_space<vmem>>, vector<1x8xf32>
    %c10_84 = arith.constant 10 : index
    %c0_85 = arith.constant 0 : index
    %144 = vector.load %arg3[%c10_84, %c0_85] : memref<12x8xf32, #tpu.memory_space<vmem>>, vector<1x8xf32>
    %c11_86 = arith.constant 11 : index
    %c0_87 = arith.constant 0 : index
    %145 = vector.load %arg3[%c11_86, %c0_87] : memref<12x8xf32, #tpu.memory_space<vmem>>, vector<1x8xf32>
    %cst_88 = arith.constant dense<0.000000e+00> : vector<16x8xf32>
    %146 = tpu.matmul %30, %138, %cst_88 {dimension_numbers = #tpu.dot_dimension_numbers<[1], [0], [0], [1], [0, 0, 1, 1], [], []>} : vector<16x32xbf16>, vector<32x8xbf16>, vector<16x8xf32> -> vector<16x8xf32>
    %147 = vector.broadcast %143 : vector<1x8xf32> to vector<16x8xf32>
    %148 = arith.addf %146, %147 : vector<16x8xf32>
    %cst_89 = arith.constant dense<0.000000e+00> : vector<16x8xf32>
    %149 = tpu.matmul %30, %140, %cst_89 {dimension_numbers = #tpu.dot_dimension_numbers<[1], [0], [0], [1], [0, 0, 1, 1], [], []>} : vector<16x32xbf16>, vector<32x8xbf16>, vector<16x8xf32> -> vector<16x8xf32>
    %150 = vector.broadcast %144 : vector<1x8xf32> to vector<16x8xf32>
    %151 = arith.addf %149, %150 : vector<16x8xf32>
    %cst_90 = arith.constant dense<0.000000e+00> : vector<16x8xf32>
    %152 = tpu.matmul %30, %142, %cst_90 {dimension_numbers = #tpu.dot_dimension_numbers<[1], [0], [0], [1], [0, 0, 1, 1], [], []>} : vector<16x32xbf16>, vector<32x8xbf16>, vector<16x8xf32> -> vector<16x8xf32>
    %153 = vector.broadcast %145 : vector<1x8xf32> to vector<16x8xf32>
    %154 = arith.addf %152, %153 : vector<16x8xf32>
    %cst_91 = arith.constant dense<0.000000e+00> : vector<16x16xf32>
    %155 = tpu.matmul %148, %151, %cst_91 {dimension_numbers = #tpu.dot_dimension_numbers<[1], [1], [0], [0], [0, 0, 1, 0], [], []>} : vector<16x8xf32>, vector<16x8xf32>, vector<16x16xf32> -> vector<16x16xf32>
    %156 = arith.addf %155, %9 : vector<16x16xf32>
    %cst_92 = arith.constant dense<0xFF800000> : vector<16xf32>
    %157 = vector.multi_reduction <maximumf>, %156, %cst_92 [1] : vector<16x16xf32> to vector<16xf32>
    %158 = vector.shape_cast %157 : vector<16xf32> to vector<16x1xf32>
    %159 = vector.broadcast %158 : vector<16x1xf32> to vector<16x16xf32>
    %160 = arith.subf %156, %159 : vector<16x16xf32>
    %161 = math.exp %160 : vector<16x16xf32>
    %cst_93 = arith.constant dense<0.000000e+00> : vector<16xf32>
    %162 = vector.multi_reduction <add>, %161, %cst_93 [1] : vector<16x16xf32> to vector<16xf32>
    %163 = vector.shape_cast %162 : vector<16xf32> to vector<16x1xf32>
    %164 = tpu.reciprocal %163 : vector<16x1xf32> -> vector<16x1xf32>
    %165 = vector.broadcast %164 : vector<16x1xf32> to vector<16x16xf32>
    %166 = arith.mulf %161, %165 : vector<16x16xf32>
    %cst_94 = arith.constant dense<0.000000e+00> : vector<16x8xf32>
    %167 = tpu.matmul %166, %154, %cst_94 {dimension_numbers = #tpu.dot_dimension_numbers<[1], [0], [0], [1], [0, 0, 1, 1], [], []>} : vector<16x16xf32>, vector<16x8xf32>, vector<16x8xf32> -> vector<16x8xf32>
    %c24 = arith.constant 24 : index
    %c0_95 = arith.constant 0 : index
    %168 = vector.load %arg4[%c24, %c0_95] : memref<32x32xbf16, #tpu.memory_space<vmem>>, vector<8x32xbf16>
    %169 = arith.truncf %167 : vector<16x8xf32> to vector<16x8xbf16>
    %cst_96 = arith.constant dense<0.000000e+00> : vector<16x32xf32>
    %170 = tpu.matmul %169, %168, %cst_96 {dimension_numbers = #tpu.dot_dimension_numbers<[1], [0], [0], [1], [0, 0, 1, 1], [], []>} : vector<16x8xbf16>, vector<8x32xbf16>, vector<16x32xf32> -> vector<16x32xf32>
    %171 = arith.addf %136, %170 : vector<16x32xf32>
    %172 = arith.addf %0, %171 : vector<16x32xf32>
    %173 = vector.broadcast %6 : vector<1x32xf32> to vector<16x32xf32>
    %174 = arith.addf %172, %173 : vector<16x32xf32>
    %cst_97 = arith.constant dense<0.000000e+00> : vector<16xf32>
    %175 = vector.multi_reduction <add>, %174, %cst_97 [1] : vector<16x32xf32> to vector<16xf32>
    %176 = vector.shape_cast %175 : vector<16xf32> to vector<16x1xf32>
    %cst_98 = arith.constant 3.200000e+01 : f32
    %177 = vector.broadcast %cst_98 : f32 to vector<16x1xf32>
    %178 = arith.divf %176, %177 : vector<16x1xf32>
    %179 = vector.broadcast %178 : vector<16x1xf32> to vector<16x32xf32>
    %180 = arith.subf %174, %179 : vector<16x32xf32>
    %181 = arith.mulf %180, %180 : vector<16x32xf32>
    %cst_99 = arith.constant dense<0.000000e+00> : vector<16xf32>
    %182 = vector.multi_reduction <add>, %181, %cst_99 [1] : vector<16x32xf32> to vector<16xf32>
    %183 = vector.shape_cast %182 : vector<16xf32> to vector<16x1xf32>
    %cst_100 = arith.constant 3.200000e+01 : f32
    %184 = vector.broadcast %cst_100 : f32 to vector<16x1xf32>
    %185 = arith.divf %183, %184 : vector<16x1xf32>
    %cst_101 = arith.constant 9.99999974E-6 : f32
    %186 = vector.broadcast %cst_101 : f32 to vector<16x1xf32>
    %187 = arith.addf %185, %186 : vector<16x1xf32>
    %188 = math.rsqrt %187 : vector<16x1xf32>
    %189 = vector.broadcast %188 : vector<16x1xf32> to vector<16x32xf32>
    %190 = arith.mulf %180, %189 : vector<16x32xf32>
    %191 = vector.broadcast %4 : vector<1x32xf32> to vector<16x32xf32>
    %192 = arith.mulf %190, %191 : vector<16x32xf32>
    %193 = vector.broadcast %5 : vector<1x32xf32> to vector<16x32xf32>
    %194 = arith.addf %192, %193 : vector<16x32xf32>
    %195 = arith.truncf %194 : vector<16x32xf32> to vector<16x32xbf16>
    %c0_102 = arith.constant 0 : index
    %c0_103 = arith.constant 0 : index
    %196 = vector.load %arg5[%c0_102, %c0_103] : memref<32x128xbf16, #tpu.memory_space<vmem>>, vector<32x128xbf16>
    %cst_104 = arith.constant dense<0.000000e+00> : vector<16x128xf32>
    %197 = tpu.matmul %195, %196, %cst_104 {dimension_numbers = #tpu.dot_dimension_numbers<[1], [0], [0], [1], [0, 0, 1, 1], [], []>} : vector<16x32xbf16>, vector<32x128xbf16>, vector<16x128xf32> -> vector<16x128xf32>
    %198 = vector.broadcast %7 : vector<1x128xf32> to vector<16x128xf32>
    %199 = arith.addf %197, %198 : vector<16x128xf32>
    %cst_105 = arith.constant 5.000000e-01 : f32
    %200 = vector.broadcast %cst_105 : f32 to vector<16x128xf32>
    %201 = arith.mulf %200, %199 : vector<16x128xf32>
    %cst_106 = arith.constant 4.471500e-02 : f32
    %202 = vector.broadcast %cst_106 : f32 to vector<16x128xf32>
    %203 = arith.mulf %202, %199 : vector<16x128xf32>
    %204 = arith.mulf %203, %199 : vector<16x128xf32>
    %205 = arith.mulf %204, %199 : vector<16x128xf32>
    %206 = arith.addf %199, %205 : vector<16x128xf32>
    %cst_107 = arith.constant 0.797884583 : f32
    %207 = vector.broadcast %cst_107 : f32 to vector<16x128xf32>
    %208 = arith.mulf %207, %206 : vector<16x128xf32>
    %209 = math.tanh %208 : vector<16x128xf32>
    %cst_108 = arith.constant 1.000000e+00 : f32
    %210 = vector.broadcast %cst_108 : f32 to vector<16x128xf32>
    %211 = arith.addf %210, %209 : vector<16x128xf32>
    %212 = arith.mulf %201, %211 : vector<16x128xf32>
    %213 = arith.truncf %212 : vector<16x128xf32> to vector<16x128xbf16>
    %c0_109 = arith.constant 0 : index
    %c0_110 = arith.constant 0 : index
    %214 = vector.load %arg6[%c0_109, %c0_110] : memref<128x32xbf16, #tpu.memory_space<vmem>>, vector<128x32xbf16>
    %cst_111 = arith.constant dense<0.000000e+00> : vector<16x32xf32>
    %215 = tpu.matmul %213, %214, %cst_111 {dimension_numbers = #tpu.dot_dimension_numbers<[1], [0], [0], [1], [0, 0, 1, 1], [], []>} : vector<16x128xbf16>, vector<128x32xbf16>, vector<16x32xf32> -> vector<16x32xf32>
    %216 = vector.broadcast %8 : vector<1x32xf32> to vector<16x32xf32>
    %217 = arith.addf %215, %216 : vector<16x32xf32>
    %218 = arith.addf %174, %217 : vector<16x32xf32>
    %c0_112 = arith.constant 0 : index
    %c0_113 = arith.constant 0 : index
    %219 = vector.load %arg9[%c0_112, %c0_113] : memref<16x32xf32, #tpu.memory_space<vmem>>, vector<16x32xf32>
    tpu.vector_store %arg9[%c0_112, %c0_113], %218 {strides = array<i32>} : memref<16x32xf32, #tpu.memory_space<vmem>>, vector<16x32xf32>,
    return
  }
  func.func @transform_0(%arg0: i32) -> (i32, i32) {
    %c0_i32 = arith.constant 0 : i32
    %c0_i32_0 = arith.constant 0 : i32
    %c0_i32_1 = arith.constant 0 : i32
    return %c0_i32, %c0_i32_0 : i32, i32
  }
  func.func @transform_1(%arg0: i32) -> (i32, i32, i32) {
    %c0_i32 = arith.constant 0 : i32
    %c0_i32_0 = arith.constant 0 : i32
    %c0_i32_1 = arith.constant 0 : i32
    %c0_i32_2 = arith.constant 0 : i32
    return %c0_i32, %c0_i32_0, %c0_i32_1 : i32, i32, i32
  }
  func.func @transform_2(%arg0: i32) -> (i32, i32) {
    %c0_i32 = arith.constant 0 : i32
    %c0_i32_0 = arith.constant 0 : i32
    %c0_i32_1 = arith.constant 0 : i32
    return %c0_i32, %c0_i32_0 : i32, i32
  }
  func.func @transform_3(%arg0: i32) -> (i32, i32) {
    %c0_i32 = arith.constant 0 : i32
    %c0_i32_0 = arith.constant 0 : i32
    %c0_i32_1 = arith.constant 0 : i32
    return %c0_i32, %c0_i32_0 : i32, i32
  }
  func.func @transform_4(%arg0: i32) -> (i32, i32) {
    %c0_i32 = arith.constant 0 : i32
    %c0_i32_0 = arith.constant 0 : i32
    %c0_i32_1 = arith.constant 0 : i32
    return %c0_i32, %c0_i32_0 : i32, i32
  }
  func.func @transform_5(%arg0: i32) -> (i32, i32) {
    %c0_i32 = arith.constant 0 : i32
    %c0_i32_0 = arith.constant 0 : i32
    %c0_i32_1 = arith.constant 0 : i32
    return %c0_i32, %c0_i32_0 : i32, i32
  }
  func.func @transform_6(%arg0: i32) -> (i32, i32) {
    %c0_i32 = arith.constant 0 : i32
    %c0_i32_0 = arith.constant 0 : i32
    %c0_i32_1 = arith.constant 0 : i32
    return %c0_i32, %c0_i32_0 : i32, i32
  }
  func.func @transform_7(%arg0: i32) -> (i32, i32) {
    %c0_i32 = arith.constant 0 : i32
    %c0_i32_0 = arith.constant 0 : i32
    %c0_i32_1 = arith.constant 0 : i32
    return %c0_i32, %c0_i32_0 : i32, i32
  }
  func.func @transform_8(%arg0: i32) -> (i32, i32) {
    %c0_i32 = arith.constant 0 : i32
    %c0_i32_0 = arith.constant 0 : i32
    %c0_i32_1 = arith.constant 0 : i32
    return %c0_i32, %c0_i32_0 : i32, i32
  }
}

</mosaic_0001>

<bundles_post_ra>
// kernel: tpu_custom_call.1
= control target key start
LH: loop header
LB: loop body
LE: loop exit
PB: predicated region body
PF: predicated region fallthrough
CT: control target
= control target key end

     0   :  { %vm36_vm0 = vcmask 261120   ;;  %s3097_s0 = inlined_call_operand.vmem [shape: f32[16,32], index: 0, kind: input, shape index: {}]   ;;  %s3098_s1 = inlined_call_operand.vmem [shape: bf16[12,32,8], index: 1, kind: input, shape index: {}]   ;;  %s3099_s2 = inlined_call_operand.vmem [shape: f32[12,8], index: 2, kind: input, shape index: {}]   ;;  %s3100_s3 = inlined_call_operand.vmem [shape: bf16[32,32], index: 3, kind: input, shape index: {}]   ;;  %s3101_s4 = inlined_call_operand.vmem [shape: bf16[32,128], index: 4, kind: input, shape index: {}]   ;;  %s3102_s5 = inlined_call_operand.vmem [shape: bf16[128,32], index: 5, kind: input, shape index: {}]   ;;  %s3103_s6 = inlined_call_operand.vmem [shape: f32[16,16], index: 6, kind: input, shape index: {}]   ;;  %s3104_s7 = inlined_call_operand.vmem [shape: f32[8,128], index: 7, kind: input, shape index: {}]   ;;  %s3105_s8 = inlined_call_operand.hbm [shape: f32[16,32], index: 8, kind: output, shape index: {}]  }
   0x1   :  { %v31_v0 = vld [vmem:[%s3097_s0] sm:$0xff]  ;;  %v32_v1 = vld [vmem:[%s3097_s0 + $0x8] sm:$0xff] }
   0x2   :  { %v37_v2 = vsel %vm36_vm0, %v31_v0, 0.0  ;;  %v40_v3 = vsel %vm36_vm0, %v32_v1, 0.0 }
   0x3   :  { %38 = vadd.xlane.f32.xlu0 %v37_v2 }
   0x7   :  { %41 = vadd.xlane.f32.xlu0 %v40_v3 }
   0x8   :  { %13 = vsyncpa [#allocation3], 0  ;;  %v2525_v14 = vld [vmem:[%s3098_s1] sm:$0xff]   ;;  %v2629_v16 = vmov 0.0   ;;  %v2527_v17 = vld [vmem:[%s3098_s1 + $0x8] sm:$0xff]   ;;  %vm2630_vm1 = vmmov 0   ;;  %v64_v22 = vlaneseq }
   0x9   :  { %v2526_v15 = vld [vmem:[%s3098_s1 + $0x20] sm:$0xff]   ;;  %2276 = vmatprep.subr.bf16.mxu1 %v2629_v16  ;;  %2292 = vmatprep.subr.bf16.mxu0 %v2629_v16  ;;  %v2528_v18 = vld [vmem:[%s3098_s1 + $0x28] sm:$0xff]   ;;  %v2529_v40 = vld [vmem:[%s3098_s1 + $0x10] sm:$0xff]   ;;  %vm268_vm2 = vcmask 64512   ;;  %vm356_vm4 = vcmask 130048   ;;  %vm846_vm5 = vcmask 1043456  }
   0xa   :  { %2277 = vmatpush3.bf16.msra.mxu1 %v2525_v14  ;;  %2293 = vmatpush3.bf16.msra.mxu0 %v2526_v15  ;;  %v2711_v26 = vshrl.u32 %v64_v22, 7  ;;  %v2717_v28 = vld [vmem:[%s3104_s7] sm:$0xff]  ;;  %v2530_v41 = vld [vmem:[%s3098_s1 + $0x30] sm:$0xff]   ;;  %v2531_v43 = vld [vmem:[%s3098_s1 + $0x18] sm:$0xff]  }
   0xb   :  { %2278 = vmatprep.subr.bf16.mxu1 %v2629_v16  ;;  %2294 = vmatprep.subr.bf16.mxu0 %v2629_v16  ;;  %v2532_v44 = vld [vmem:[%s3098_s1 + $0x38] sm:$0xff]   ;;  %v2533_v45 = vld [vmem:[%s3098_s1 + $0x50] sm:$0xff]   ;;  %v2065_v47 = vld [vmem:[%s3099_s2] ss:$0 sm:$0xff] }
   0xc   :  { %2280 = vmatprep.mubr.msk.bf16.mxu1 %vm2630_vm1, %v2629_v16  ;;  %2296 = vmatprep.mubr.msk.bf16.mxu0 %vm2630_vm1, %v2629_v16  ;;  %v66_v27 = vsub.s32 0, %v2711_v26  ;;  %v72_v31 = vsub.s32 1, %v2711_v26  ;;  %v2534_v46 = vld [vmem:[%s3098_s1 + $0x58] sm:$0xff]   ;;  %v2073_v49 = vld [vmem:[%s3099_s2 + $0x2] ss:$0 sm:$0xff]  ;;  %vm2784_vm3 = vmpackc.low %vm268_vm2, %vm268_vm2 }
   0xd   :  { %v2069_v61 = vld [vmem:[%s3099_s2 + $0x1] ss:$0 sm:$0xff]  ;;  %v2777_v2 = vld [vmem:[%s3099_s2 + $0x3] ss:$0 sm:$0xff]  ;;  %v2801_v22 = vld [vmem:[%s3103_s6 + $0x8] sm:$0xff] }
   0xe   :  { %2279 = vmatpush3.bf16.msra.mxu1 %v2527_v17  ;;  %2295 = vmatpush3.bf16.msra.mxu0 %v2528_v18  ;;  %v67_v30 = vrot.slane %v2717_v28, %v66_v27  ;;  %v73_v34 = vrot.slane %v2717_v28, %v72_v31 }
   0xf   :  { %2284 = vmatprep.subr.bf16.mxu1 %v2629_v16  ;;  %2314 = vmatprep.subr.bf16.mxu0 %v2629_v16 }
  0x90   :  { %v39_v4 = vpop.xlane.xlu0 %38 }
  0x91   :  { %v44_v5 = vmul.f32 0.03125, %v39_v4 }
  0x93   :  { %v46_v6 = vsub.f32 %v31_v0, %v44_v5 }
  0x94   :  { %v42_v7 = vpop.xlane.xlu0 %41 }
  0x95   :  { %v45_v8 = vmul.f32 0.03125, %v42_v7  ;;  %v48_v9 = vmul.f32 %v46_v6, %v46_v6 }
  0x97   :  { %v47_v10 = vsub.f32 %v32_v1, %v45_v8  ;;  %v50_v11 = vsel %vm36_vm0, %v48_v9, 0.0 }
  0x98   :  { %51 = vadd.xlane.f32.xlu1 %v50_v11 }
  0x99   :  { %v49_v12 = vmul.f32 %v47_v10, %v47_v10 }
  0x9b   :  { %v53_v13 = vsel %vm36_vm0, %v49_v12, 0.0  ;;  %v2103_v12 = vld [vmem:[%s3099_s2 + $0x5] ss:$0 sm:$0xff] }
  0x9c   :  { %54 = vadd.xlane.f32.xlu1 %v53_v13 }
 0x125   :  { %v52_v19 = vpop.xlane.xlu1 %51 }
 0x126   :  { %v56_v20 = vmul.f32 0.03125, %v52_v19 }
 0x128   :  { %v58_v21 = vadd.f32 1e-05, %v56_v20 }
 0x129   :  { %v55_v23 = vpop.xlane.xlu1 %54 }
 0x12a   :  { %2559 = vrsqrt.f32 %v58_v21  ;;  %v57_v24 = vmul.f32 0.03125, %v55_v23  ;;  %v2806_v23 = vld [vmem:[%s3103_s6] sm:$0xff] }
 0x12c   :  { %v59_v25 = vadd.f32 1e-05, %v57_v24 }
 0x12e   :  { %2561 = vrsqrt.f32 %v59_v25 }
 0x134   :  { %v2560_v29 = vpop.eup %2559 }
 0x135   :  { %v62_v32 = vmul.f32 %v2560_v29, %v46_v6 }
 0x137   :  { %v68_v35 = vmul.f32 %v67_v30, %v62_v32 }
 0x138   :  { %v2562_v33 = vpop.eup %2561 }
 0x139   :  { %v63_v36 = vmul.f32 %v2562_v33, %v47_v10  ;;  %v74_v38 = vadd.f32 %v73_v34, %v68_v35 }
 0x13b   :  { %v69_v37 = vmul.f32 %v67_v30, %v63_v36 }
 0x13d   :  { %v75_v39 = vadd.f32 %v73_v34, %v69_v37 }
 0x13f   :  { %v2728_v42 = vpack.c.bf16 %v75_v39, %v74_v38 }
 0x141   :  { %2281 = vmatmul.mubr.msk.bf16.vlgmr.msra.gmra.mrb[0].mxu1 %vm36_vm0, %v2728_v42  ;;  %2297 = vmatmul.mubr.msk.bf16.vlgmr.msra.gmra.mrb[0].mxu0 %vm36_vm0, %v2728_v42 }
 0x142   :  { %2285 = vmatpush3.bf16.msra.mxu1 %v2529_v40  ;;  %2315 = vmatpush3.bf16.msra.mxu0 %v2530_v41 }
 0x143   :  { %2286 = vmatprep.subr.bf16.mxu1 %v2629_v16  ;;  %2316 = vmatprep.subr.bf16.mxu0 %v2629_v16 }
 0x144   :  { %2288 = vmatprep.mubr.msk.bf16.mxu1 %vm2630_vm1, %v2629_v16  ;;  %2318 = vmatprep.mubr.msk.bf16.mxu0 %vm2630_vm1, %v2629_v16 }
 0x146   :  { %2287 = vmatpush3.bf16.msra.mxu1 %v2531_v43  ;;  %2317 = vmatpush3.bf16.msra.mxu0 %v2532_v44 }
 0x147   :  { %2330 = vmatprep.subr.bf16.mxu0 %v2629_v16 }
 0x149   :  { %2289 = vmatmul.mubr.msk.bf16.vlgmr.msra.gmra.mrb[4].mxu1 %vm36_vm0, %v2728_v42  ;;  %2319 = vmatmul.mubr.msk.bf16.vlgmr.msra.gmra.mrb[4].mxu0 %vm36_vm0, %v2728_v42 }
 0x14a   :  { %2331 = vmatpush3.bf16.msra.mxu0 %v2533_v45  ;;  %2334 = vmatprep.mubr.msk.bf16.mxu0 %vm2630_vm1, %v2629_v16 }
 0x14b   :  { %2332 = vmatprep.subr.bf16.mxu0 %v2629_v16 }
 0x14e   :  { %2333 = vmatpush3.bf16.msra.mxu0 %v2534_v46 }
 0x151   :  { %2335 = vmatmul.mubr.msk.bf16.vlgmr.msra.gmra.mrb[8].mxu0 %vm36_vm0, %v2728_v42 }
 0x214   :  { %v147_v48 = vpop.f32.mrb[0].mxu1  ;;  %v261_v50 = vpop.f32.mrb[0].mxu0 }
 0x215   :  { %v148_v51 = vadd.f32 %v2065_v47, %v147_v48  ;;  %v2282_v52 = vpop.f32.mrb[1].mxu1  ;;  %v2298_v53 = vpop.f32.mrb[1].mxu0  ;;  %v262_v56 = vadd.f32 %v2073_v49, %v261_v50  ;;  %v2535_v48 = vld [vmem:[%s3098_s1 + $0x40] sm:$0xff]   ;;  %v2536_v50 = vld [vmem:[%s3098_s1 + $0x48] sm:$0xff]  }
 0x216   :  { %v150_v54 = vpop.f32.mrb[2].mxu1  ;;  %v264_v55 = vpop.f32.mrb[2].mxu0 }
 0x217   :  { %v265_v57 = vadd.f32 %v2073_v49, %v264_v55  ;;  %v2283_v58 = vpop.f32.mrb[3].mxu1  ;;  %v2299_v59 = vpop.f32.mrb[3].mxu0  ;;  %2304 = vmatprep.mubr.msk.f32.mxu1 %vm268_vm2, %v148_v51  ;;  %v151_v20 = vadd.f32 %v2065_v47, %v150_v54  ;;  %v2099_v55 = vld [vmem:[%s3099_s2 + $0x4] ss:$0 sm:$0xff] }
 0x219   :  { %v2486_v60 = vpack.c.bf16 %v265_v57, %v262_v56 }
 0x21c   :  { %v204_v62 = vpop.f32.mrb[4].mxu1  ;;  %v2772_v63 = vpop.f32.mrb[4].mxu0 }
 0x21d   :  { %v2290_v0 = vpop.f32.mrb[5].mxu1  ;;  %v2320_v1 = vpop.f32.mrb[5].mxu0  ;;  %v205_v5 = vadd.f32 %v2069_v61, %v204_v62  ;;  %v531_v51 = vadd.f32 %v2777_v2, %v2772_v63 }
 0x21e   :  { %v207_v3 = vpop.f32.mrb[6].mxu1  ;;  %v533_v4 = vpop.f32.mrb[6].mxu0 }
 0x21f   :  { %v208_v6 = vadd.f32 %v2069_v61, %v207_v3  ;;  %v2780_v7 = vadd.f32 %v2777_v2, %v533_v4  ;;  %v2291_v8 = vpop.f32.mrb[7].mxu1  ;;  %v2321_v9 = vpop.f32.mrb[7].mxu0 }
 0x221   :  { %v2480_v11 = vpack.c.bf16 %v208_v6, %v205_v5 }
 0x223   :  { %2482 = vmatprep.subr.msk.bf16.mxu1 %vm2784_vm3, %v2480_v11 }
 0x224   :  { %2485 = vmatpush3.bf16.xpose.msk.msra.mxu1 %vm2784_vm3, %v2480_v11  ;;  %v644_v13 = vpop.f32.mrb[8].mxu0 }
 0x225   :  { %2487 = vmatprep.subr.bf16.mxu1 %v2486_v60  ;;  %v2336_v14 = vpop.f32.mrb[9].mxu0  ;;  %v645_v17 = vadd.f32 %v2103_v12, %v644_v13 }
 0x226   :  { %v647_v15 = vpop.f32.mrb[10].mxu0 }
 0x227   :  { %v648_v18 = vadd.f32 %v2103_v12, %v647_v15  ;;  %v2337_v19 = vpop.f32.mrb[11].mxu0 }
 0x229   :  { %v2496_v21 = vpack.c.bf16 %v648_v18, %v645_v17 }
 0x22b   :  { %2305 = vmatmul.mubr.msk.f32.vlgmr.msra.gmra.mrb[8].mxu1 %vm268_vm2, %v151_v20  ;;  %2497 = vmatprep.subr.bf16.mxu0 %v2496_v21  ;;  %v460_v20 = vld [vmem:[%s3100_s3] sm:$0xf] }
 0x22c   :  { %2489 = vmatpush3.bf16.msra.mxu1 %v2486_v60  ;;  %2499 = vmatpush3.bf16.msra.mxu0 %v2496_v21 }
 0x22d   :  { %2322 = vmatprep.subr.bf16.mxu1 %v2629_v16  ;;  %2358 = vmatprep.subr.bf16.mxu0 %v2629_v16 }
 0x2fe   :  { %v2306_v24 = vpop.f32.mrb[8].mxu1 }
 0x2ff   :  { %v353_v25 = vadd.f32 %v2306_v24, %v2801_v22  ;;  %v347_v27 = vpop.f32.mrb[9].mxu1 }
 0x300   :  { %v348_v29 = vadd.f32 %v347_v27, %v2806_v23  ;;  %v895_v27 = vsel %vm846_vm5, %v460_v20, 0 }
 0x301   :  { %v360_v30 = vsel %vm356_vm4, %v353_v25, -inf }
 0x302   :  { %361 = vmax.xlane.f32.xlu1 %v360_v30  ;;  %v357_v31 = vsel %vm356_vm4, %v348_v29, -inf  ;;  %v2538_v30 = vld [vmem:[%s3098_s1 + $0x78] sm:$0xff]  }
 0x303   :  { %358 = vmax.xlane.f32.xlu0 %v357_v31  ;;  %v841_v31 = vld [vmem:[%s3100_s3 + $0x4] sm:$0xf] }
 0x38f   :  { %v362_v32 = vpop.xlane.xlu1 %361 }
 0x390   :  { %v364_v33 = vsub.f32 %v353_v25, %v362_v32  ;;  %v359_v34 = vpop.xlane.xlu0 %358  ;;  %v848_v32 = vsel %vm846_vm5, %v841_v31, 0 }
 0x391   :  { %v363_v35 = vsub.f32 %v348_v29, %v359_v34  ;;  %v2537_v29 = vld [vmem:[%s3098_s1 + $0x70] sm:$0xff]  }
 0x392   :  { %v367_v36 = vmul.f32 1.442695, %v364_v33 }
 0x393   :  { %v365_v37 = vmul.f32 1.442695, %v363_v35  ;;  %v2539_v35 = vld [vmem:[%s3098_s1 + $0x60] sm:$0xff]  }
 0x394   :  { %2563 = vpow2.f32 %v367_v36 }
 0x395   :  { %2565 = vpow2.f32 %v365_v37 }
 0x39e   :  { %v2564_v38 = vpop.eup %2563 }
 0x39f   :  { %v2566_v39 = vpop.eup %2565  ;;  %v372_v40 = vsel %vm356_vm4, %v2564_v38, 0.0 }
 0x3a0   :  { %373 = vadd.xlane.f32.xlu1 %v372_v40  ;;  %v369_v41 = vsel %vm356_vm4, %v2566_v39, 0.0 }
 0x3a1   :  { %370 = vadd.xlane.f32.xlu0 %v369_v41 }
 0x42d   :  { %v374_v43 = vpop.xlane.xlu1 %373 }
 0x42e   :  { %2567 = vrcp.f32 %v374_v43  ;;  %v371_v44 = vpop.xlane.xlu0 %370  ;;  %v2541_v43 = vld [vmem:[%s3098_s1 + $0x80] sm:$0xff]  }
 0x42f   :  { %2569 = vrcp.f32 %v371_v44  ;;  %v2131_v44 = vld [vmem:[%s3099_s2 + $0x7] ss:$0 sm:$0xff] }
 0x438   :  { %v2568_v45 = vpop.eup %2567 }
 0x439   :  { %v2570_v46 = vpop.eup %2569  ;;  %v378_v49 = vmul.f32 %v2568_v45, %v2564_v38 }
 0x43a   :  { %v377_v47 = vmul.f32 %v2570_v46, %v2566_v39  ;;  %v2540_v39 = vld [vmem:[%s3098_s1 + $0x68] sm:$0xff]  }
 0x43c   :  { %2311 = vmatprep.mubr.msk.f32.mxu1 %vm356_vm4, %v377_v47  ;;  %v2542_v47 = vld [vmem:[%s3098_s1 + $0x88] sm:$0xff]  }
 0x43d   :  { %2312 = vmatmul.mubr.msk.f32.vlgmr.msra.gmra.mrb[10].mxu1 %vm356_vm4, %v378_v49 }
 0x43e   :  { %2323 = vmatpush3.bf16.msra.mxu1 %v2535_v48  ;;  %2326 = vmatprep.mubr.msk.bf16.mxu1 %vm2630_vm1, %v2629_v16 }
 0x43f   :  { %2324 = vmatprep.subr.bf16.mxu1 %v2629_v16 }
 0x442   :  { %2325 = vmatpush3.bf16.msra.mxu1 %v2536_v50 }
 0x445   :  { %2327 = vmatmul.mubr.msk.bf16.vlgmr.msra.gmra.mrb[12].mxu1 %vm36_vm0, %v2728_v42 }
 0x446   :  { %2342 = vmatprep.mubr.msk.f32.mxu1 %vm268_vm2, %v531_v51 }
 0x510   :  { %v2313_v52 = vpop.f32.mrb[10].mxu1 }
 0x511   :  { %v451_v53 = vpop.f32.mrb[11].mxu1 }
 0x512   :  { %v461_v54 = vpack.c.bf16 %v2313_v52, %v451_v53 }
 0x518   :  { %v587_v56 = vpop.f32.mrb[12].mxu1 }
 0x519   :  { %v2328_v57 = vpop.f32.mrb[13].mxu1  ;;  %v588_v59 = vadd.f32 %v2099_v55, %v587_v56 }
 0x51a   :  { %v590_v58 = vpop.f32.mrb[14].mxu1 }
 0x51b   :  { %v591_v60 = vadd.f32 %v2099_v55, %v590_v58  ;;  %v2329_v61 = vpop.f32.mrb[15].mxu1 }
 0x51d   :  { %v2490_v62 = vpack.c.bf16 %v591_v60, %v588_v59  ;;  %v2127_v59 = vld [vmem:[%s3099_s2 + $0x6] ss:$0 sm:$0xff] }
 0x51f   :  { %2492 = vmatprep.subr.msk.bf16.mxu1 %vm2784_vm3, %v2490_v62 }
 0x520   :  { %2495 = vmatpush3.bf16.xpose.msk.msra.mxu1 %vm2784_vm3, %v2490_v62 }
 0x521   :  { %2352 = vmatprep.subr.bf16.mxu1 %v2629_v16 }
 0x527   :  { %2343 = vmatmul.mubr.msk.f32.vlgmr.msra.gmra.mrb[16].mxu1 %vm268_vm2, %v2780_v7 }
 0x528   :  { %2354 = vmatprep.mubr.msk.bf16.mxu1 %vm2630_vm1, %v2629_v16  ;;  %2353 = vmatpush3.bf16.msra.mxu1 %v848_v32  ;;  %v1317_v32 = vld [vmem:[%s3100_s3 + $0x8] sm:$0xf] }
 0x529   :  { %2364 = vmatprep.subr.bf16.mxu1 %v2629_v16 }
 0x5fa   :  { %v2344_v63 = vpop.f32.mrb[16].mxu1 }
 0x5fb   :  { %v735_v0 = vadd.f32 %v2344_v63, %v2801_v22  ;;  %v729_v1 = vpop.f32.mrb[17].mxu1 }
 0x5fc   :  { %v730_v2 = vadd.f32 %v729_v1, %v2806_v23 }
 0x5fd   :  { %v741_v3 = vsel %vm356_vm4, %v735_v0, -inf }
 0x5fe   :  { %742 = vmax.xlane.f32.xlu1 %v741_v3  ;;  %v738_v4 = vsel %vm356_vm4, %v730_v2, -inf }
 0x5ff   :  { %739 = vmax.xlane.f32.xlu0 %v738_v4 }
 0x68b   :  { %v743_v5 = vpop.xlane.xlu1 %742 }
 0x68c   :  { %v745_v6 = vsub.f32 %v735_v0, %v743_v5  ;;  %v740_v8 = vpop.xlane.xlu0 %739 }
 0x68d   :  { %v744_v9 = vsub.f32 %v730_v2, %v740_v8  ;;  %v2135_v2 = vld [vmem:[%s3099_s2 + $0x8] ss:$0 sm:$0xff] }
 0x68e   :  { %v748_v7 = vmul.f32 1.442695, %v745_v6 }
 0x68f   :  { %v746_v11 = vmul.f32 1.442695, %v744_v9 }
 0x690   :  { %2571 = vpow2.f32 %v748_v7 }
 0x691   :  { %2573 = vpow2.f32 %v746_v11 }
 0x69a   :  { %v2572_v12 = vpop.eup %2571 }
 0x69b   :  { %v2574_v13 = vpop.eup %2573  ;;  %v753_v14 = vsel %vm356_vm4, %v2572_v12, 0.0 }
 0x69c   :  { %754 = vadd.xlane.f32.xlu1 %v753_v14  ;;  %v750_v15 = vsel %vm356_vm4, %v2574_v13, 0.0 }
 0x69d   :  { %751 = vadd.xlane.f32.xlu0 %v750_v15 }
 0x729   :  { %v755_v17 = vpop.xlane.xlu1 %754 }
 0x72a   :  { %2575 = vrcp.f32 %v755_v17  ;;  %v752_v18 = vpop.xlane.xlu0 %751 }
 0x72b   :  { %2577 = vrcp.f32 %v752_v18 }
 0x734   :  { %v2576_v19 = vpop.eup %2575 }
 0x735   :  { %v2578_v21 = vpop.eup %2577  ;;  %v759_v25 = vmul.f32 %v2576_v19, %v2572_v12 }
 0x736   :  { %v758_v24 = vmul.f32 %v2578_v21, %v2574_v13 }
 0x738   :  { %2349 = vmatprep.mubr.msk.f32.mxu0 %vm356_vm4, %v758_v24 }
 0x739   :  { %2350 = vmatmul.mubr.msk.f32.vlgmr.msra.gmra.mrb[12].mxu0 %vm356_vm4, %v759_v25 }
 0x73a   :  { %2359 = vmatpush3.bf16.msra.mxu0 %v895_v27  ;;  %2360 = vmatprep.mubr.msk.bf16.mxu0 %vm2630_vm1, %v2629_v16 }
 0x73b   :  { %2372 = vmatprep.subr.bf16.mxu0 %v2629_v16 }
 0x73d   :  { %2361 = vmatmul.mubr.msk.bf16.vlgmr.msra.gmra.mrb[16].mxu0 %vm268_vm2, %v461_v54 }
 0x73e   :  { %2373 = vmatpush3.bf16.msra.mxu0 %v2537_v29  ;;  %2376 = vmatprep.mubr.msk.bf16.mxu0 %vm2630_vm1, %v2629_v16 }
 0x73f   :  { %2374 = vmatprep.subr.bf16.mxu0 %v2629_v16 }
 0x742   :  { %2375 = vmatpush3.bf16.msra.mxu0 %v2538_v30 }
 0x745   :  { %2377 = vmatmul.mubr.msk.bf16.vlgmr.msra.gmra.mrb[20].mxu0 %vm36_vm0, %v2728_v42 }
 0x80c   :  { %v2351_v33 = vpop.f32.mrb[12].mxu0 }
 0x80d   :  { %v832_v34 = vpop.f32.mrb[13].mxu0 }
 0x80e   :  { %v842_v36 = vpack.c.bf16 %v2351_v33, %v832_v34  ;;  %v1323_v33 = vsel %vm846_vm5, %v1317_v32, 0 }
 0x810   :  { %2355 = vmatmul.mubr.msk.bf16.vlgmr.msra.gmra.mrb[20].mxu1 %vm268_vm2, %v842_v36  ;;  %v931_v37 = vpop.f32.mrb[16].mxu0 }
 0x811   :  { %v2362_v38 = vpop.f32.mrb[17].mxu0  ;;  %2365 = vmatpush3.bf16.msra.mxu1 %v2539_v35  ;;  %2368 = vmatprep.mubr.msk.bf16.mxu1 %vm2630_vm1, %v2629_v16 }
 0x812   :  { %v934_v40 = vpop.f32.mrb[18].mxu0  ;;  %2366 = vmatprep.subr.bf16.mxu1 %v2629_v16 }
 0x813   :  { %v2363_v41 = vpop.f32.mrb[19].mxu0 }
 0x814   :  { %v2544_v41 = vld [vmem:[%s3098_s1 + $0x98] sm:$0xff]  }
 0x815   :  { %2367 = vmatpush3.bf16.msra.mxu1 %v2540_v39  ;;  %v2543_v39 = vld [vmem:[%s3098_s1 + $0x90] sm:$0xff]  }
 0x816   :  { %2380 = vmatprep.subr.bf16.mxu1 %v2629_v16 }
 0x818   :  { %2369 = vmatmul.mubr.msk.bf16.vlgmr.msra.gmra.mrb[24].mxu1 %vm36_vm0, %v2728_v42  ;;  %v1063_v45 = vpop.f32.mrb[20].mxu0 }
 0x819   :  { %v2378_v46 = vpop.f32.mrb[21].mxu0  ;;  %2381 = vmatpush3.bf16.msra.mxu1 %v2541_v43  ;;  %2384 = vmatprep.mubr.msk.bf16.mxu1 %vm2630_vm1, %v2629_v16  ;;  %v1064_v49 = vadd.f32 %v2131_v44, %v1063_v45  ;;  %v2545_v43 = vld [vmem:[%s3098_s1 + $0xb0] sm:$0xff]  }
 0x81a   :  { %v1066_v48 = vpop.f32.mrb[22].mxu0  ;;  %2382 = vmatprep.subr.bf16.mxu1 %v2629_v16 }
 0x81b   :  { %v1067_v50 = vadd.f32 %v2131_v44, %v1066_v48  ;;  %v2379_v51 = vpop.f32.mrb[23].mxu0  ;;  %v2546_v44 = vld [vmem:[%s3098_s1 + $0xb8] sm:$0xff]  }
 0x81d   :  { %v2500_v52 = vpack.c.bf16 %v1067_v50, %v1064_v49  ;;  %2383 = vmatpush3.bf16.msra.mxu1 %v2542_v47  ;;  %v2547_v47 = vld [vmem:[%s3098_s1 + $0xa0] sm:$0xff]   ;;  %v2548_v49 = vld [vmem:[%s3098_s1 + $0xa8] sm:$0xff]  }
 0x81e   :  { %2402 = vmatprep.subr.bf16.mxu1 %v2629_v16  ;;  %v2158_v50 = vld [vmem:[%s3099_s2 + $0x9] ss:$0 sm:$0xff] }
 0x81f   :  { %2502 = vmatprep.subr.msk.bf16.mxu0 %vm2784_vm3, %v2500_v52 }
 0x820   :  { %2385 = vmatmul.mubr.msk.bf16.vlgmr.msra.gmra.mrb[28].mxu1 %vm36_vm0, %v2728_v42  ;;  %2505 = vmatpush3.bf16.xpose.msk.msra.mxu0 %vm2784_vm3, %v2500_v52 }
 0x821   :  { %2404 = vmatprep.mubr.msk.bf16.mxu1 %vm2630_vm1, %v2629_v16  ;;  %2403 = vmatpush3.bf16.msra.mxu1 %v1323_v33 }
 0x822   :  { %2416 = vmatprep.subr.bf16.mxu1 %v2629_v16 }
 0x8e3   :  { %v884_v53 = vpop.f32.mrb[20].mxu1 }
 0x8e4   :  { %v2908_v54 = vadd.f32 %v931_v37, %v884_v53  ;;  %v2356_v55 = vpop.f32.mrb[21].mxu1 }
 0x8e5   :  { %v887_v56 = vpop.f32.mrb[22].mxu1 }
 0x8e6   :  { %v2910_v57 = vadd.f32 %v934_v40, %v887_v56  ;;  %v2357_v58 = vpop.f32.mrb[23].mxu1 }
 0x8eb   :  { %v1006_v60 = vpop.f32.mrb[24].mxu1 }
 0x8ec   :  { %v1007_v61 = vadd.f32 %v2127_v59, %v1006_v60  ;;  %v2370_v62 = vpop.f32.mrb[25].mxu1 }
 0x8ed   :  { %v1009_v63 = vpop.f32.mrb[26].mxu1 }
 0x8ee   :  { %v1010_v0 = vadd.f32 %v2127_v59, %v1009_v63  ;;  %v2371_v1 = vpop.f32.mrb[27].mxu1  ;;  %2392 = vmatprep.mubr.msk.f32.mxu0 %vm268_vm2, %v1007_v61  ;;  %v2166_v59 = vld [vmem:[%s3099_s2 + $0xb] ss:$0 sm:$0xff] }
 0x8f0   :  { %2393 = vmatmul.mubr.msk.f32.vlgmr.msra.gmra.mrb[14].mxu0 %vm268_vm2, %v1010_v0 }
 0x8f3   :  { %v1120_v3 = vpop.f32.mrb[28].mxu1 }
 0x8f4   :  { %v2386_v4 = vpop.f32.mrb[29].mxu1  ;;  %v1121_v6 = vadd.f32 %v2135_v2, %v1120_v3 }
 0x8f5   :  { %v1123_v5 = vpop.f32.mrb[30].mxu1 }
 0x8f6   :  { %v1124_v8 = vadd.f32 %v2135_v2, %v1123_v5  ;;  %v2387_v9 = vpop.f32.mrb[31].mxu1 }
 0x8f7   :  { %v2162_v9 = vld [vmem:[%s3099_s2 + $0xa] ss:$0 sm:$0xff] }
 0x8f8   :  { %v2506_v7 = vpack.c.bf16 %v1124_v8, %v1121_v6 }
 0x8fa   :  { %2507 = vmatprep.subr.bf16.mxu0 %v2506_v7 }
 0x8fb   :  { %2509 = vmatpush3.bf16.msra.mxu0 %v2506_v7 }
 0x8fc   :  { %2408 = vmatprep.subr.bf16.mxu0 %v2629_v16 }
 0x9c3   :  { %v2394_v11 = vpop.f32.mrb[14].mxu0 }
 0x9c4   :  { %v1211_v12 = vadd.f32 %v2394_v11, %v2801_v22  ;;  %v1205_v13 = vpop.f32.mrb[15].mxu0 }
 0x9c5   :  { %v1206_v14 = vadd.f32 %v1205_v13, %v2806_v23 }
 0x9c6   :  { %v1217_v15 = vsel %vm356_vm4, %v1211_v12, -inf }
 0x9c7   :  { %1218 = vmax.xlane.f32.xlu1 %v1217_v15  ;;  %v1214_v17 = vsel %vm356_vm4, %v1206_v14, -inf }
 0x9c8   :  { %1215 = vmax.xlane.f32.xlu0 %v1214_v17 }
 0xa54   :  { %v1219_v18 = vpop.xlane.xlu1 %1218 }
 0xa55   :  { %v1221_v19 = vsub.f32 %v1211_v12, %v1219_v18  ;;  %v1216_v20 = vpop.xlane.xlu0 %1215 }
 0xa56   :  { %v1220_v21 = vsub.f32 %v1206_v14, %v1216_v20 }
 0xa57   :  { %v1224_v24 = vmul.f32 1.442695, %v1221_v19 }
 0xa58   :  { %v1222_v25 = vmul.f32 1.442695, %v1220_v21 }
 0xa59   :  { %2579 = vpow2.f32 %v1224_v24 }
 0xa5a   :  { %2581 = vpow2.f32 %v1222_v25 }
 0xa63   :  { %v2580_v27 = vpop.eup %2579 }
 0xa64   :  { %v2582_v29 = vpop.eup %2581  ;;  %v1229_v30 = vsel %vm356_vm4, %v2580_v27, 0.0 }
 0xa65   :  { %1230 = vadd.xlane.f32.xlu1 %v1229_v30  ;;  %v1226_v31 = vsel %vm356_vm4, %v2582_v29, 0.0 }
 0xa66   :  { %1227 = vadd.xlane.f32.xlu0 %v1226_v31 }
 0xaf2   :  { %v1231_v34 = vpop.xlane.xlu1 %1230 }
 0xaf3   :  { %2583 = vrcp.f32 %v1231_v34  ;;  %v1228_v35 = vpop.xlane.xlu0 %1227 }
 0xaf4   :  { %2585 = vrcp.f32 %v1228_v35 }
 0xafd   :  { %v2584_v36 = vpop.eup %2583 }
 0xafe   :  { %v2586_v37 = vpop.eup %2585  ;;  %v1235_v40 = vmul.f32 %v2584_v36, %v2580_v27 }
 0xaff   :  { %v1234_v38 = vmul.f32 %v2586_v37, %v2582_v29 }
 0xb01   :  { %2399 = vmatprep.mubr.msk.f32.mxu0 %vm356_vm4, %v1234_v38 }
 0xb02   :  { %2400 = vmatmul.mubr.msk.f32.vlgmr.msra.gmra.mrb[24].mxu0 %vm356_vm4, %v1235_v40 }
 0xb03   :  { %2409 = vmatpush3.bf16.msra.mxu0 %v2543_v39  ;;  %2412 = vmatprep.mubr.msk.bf16.mxu0 %vm2630_vm1, %v2629_v16  ;;  %v1747_v39 = vld [vmem:[%s3100_s3 + $0xc] sm:$0xf] }
 0xb04   :  { %2410 = vmatprep.subr.bf16.mxu0 %v2629_v16  ;;  %v1753_v40 = vsel %vm846_vm5, %v1747_v39, 0 }
 0xb07   :  { %2411 = vmatpush3.bf16.msra.mxu0 %v2544_v41 }
 0xb08   :  { %2424 = vmatprep.subr.bf16.mxu0 %v2629_v16 }
 0xb0a   :  { %2413 = vmatmul.mubr.msk.bf16.vlgmr.msra.gmra.mrb[28].mxu0 %vm36_vm0, %v2728_v42 }
 0xb0b   :  { %2425 = vmatpush3.bf16.msra.mxu0 %v2545_v43  ;;  %2428 = vmatprep.mubr.msk.bf16.mxu0 %vm2630_vm1, %v2629_v16 }
 0xb0c   :  { %2426 = vmatprep.subr.bf16.mxu0 %v2629_v16 }
 0xb0f   :  { %2427 = vmatpush3.bf16.msra.mxu0 %v2546_v44 }
 0xb10   :  { %2460 = vmatprep.subr.bf16.mxu0 %v2629_v16 }
 0xb12   :  { %2429 = vmatmul.mubr.msk.bf16.vlgmr.msra.gmra.mrb[32].mxu0 %vm36_vm0, %v2728_v42 }
 0xb13   :  { %2476 = vmatprep.mubr.msk.bf16.mxu0 %vm2630_vm1, %v2629_v16 }
 0xbd5   :  { %v2401_v45 = vpop.f32.mrb[24].mxu0 }
 0xbd6   :  { %v1308_v46 = vpop.f32.mrb[25].mxu0 }
 0xbd7   :  { %v1318_v48 = vpack.c.bf16 %v2401_v45, %v1308_v46  ;;  %v1802_v45 = vsub.s32 4, %v2711_v26 }
 0xbd9   :  { %2405 = vmatmul.mubr.msk.bf16.vlgmr.msra.gmra.mrb[32].mxu1 %vm268_vm2, %v1318_v48  ;;  %v1803_v48 = vrot.slane %v2717_v28, %v1802_v45 }
 0xbda   :  { %2417 = vmatpush3.bf16.msra.mxu1 %v2547_v47  ;;  %2420 = vmatprep.mubr.msk.bf16.mxu1 %vm2630_vm1, %v2629_v16 }
 0xbdb   :  { %2418 = vmatprep.subr.bf16.mxu1 %v2629_v16 }
 0xbdd   :  { %v1436_v51 = vpop.f32.mrb[28].mxu0 }
 0xbde   :  { %v2414_v52 = vpop.f32.mrb[29].mxu0  ;;  %2419 = vmatpush3.bf16.msra.mxu1 %v2548_v49  ;;  %v1437_v55 = vadd.f32 %v2158_v50, %v1436_v51  ;;  %v2603_v51 = vld [vmem:[%s3097_s0] sm:$0xff] }
 0xbdf   :  { %v1439_v53 = vpop.f32.mrb[30].mxu0 }
 0xbe0   :  { %v1440_v56 = vadd.f32 %v2158_v50, %v1439_v53  ;;  %v2415_v58 = vpop.f32.mrb[31].mxu0 }
 0xbe1   :  { %2421 = vmatmul.mubr.msk.bf16.vlgmr.msra.gmra.mrb[36].mxu1 %vm36_vm0, %v2728_v42  ;;  %v2604_v58 = vld [vmem:[%s3097_s0 + $0x8] sm:$0xff] }
 0xbe2   :  { %2436 = vmatprep.mubr.msk.f32.mxu1 %vm268_vm2, %v1437_v55 }
 0xbe5   :  { %v1550_v60 = vpop.f32.mrb[32].mxu0 }
 0xbe6   :  { %v2430_v61 = vpop.f32.mrb[33].mxu0  ;;  %v1551_v63 = vadd.f32 %v2166_v59, %v1550_v60 }
 0xbe7   :  { %v1553_v62 = vpop.f32.mrb[34].mxu0 }
 0xbe8   :  { %v1554_v0 = vadd.f32 %v2166_v59, %v1553_v62  ;;  %v2431_v1 = vpop.f32.mrb[35].mxu0 }
 0xbea   :  { %v2516_v2 = vpack.c.bf16 %v1554_v0, %v1551_v63 }
 0xcac   :  { %v1359_v3 = vpop.f32.mrb[32].mxu1 }
 0xcad   :  { %v2980_v4 = vadd.f32 %v1359_v3, %v2908_v54  ;;  %v2406_v5 = vpop.f32.mrb[33].mxu1 }
 0xcae   :  { %v1362_v6 = vpop.f32.mrb[34].mxu1 }
 0xcaf   :  { %v2983_v42 = vadd.f32 %v1362_v6, %v2910_v57  ;;  %v2407_v8 = vpop.f32.mrb[35].mxu1 }
 0xcb4   :  { %v1493_v7 = vpop.f32.mrb[36].mxu1 }
 0xcb5   :  { %v2422_v11 = vpop.f32.mrb[37].mxu1  ;;  %v1494_v13 = vadd.f32 %v2162_v9, %v1493_v7  ;;  %v2550_v7 = vld [vmem:[%s3101_s4 + $0x8] sm:$0xff]  }
 0xcb6   :  { %v1496_v12 = vpop.f32.mrb[38].mxu1 }
 0xcb7   :  { %v1497_v14 = vadd.f32 %v2162_v9, %v1496_v12  ;;  %v2423_v15 = vpop.f32.mrb[39].mxu1  ;;  %v2549_v9 = vld [vmem:[%s3101_s4] sm:$0xff]  }
 0xcb9   :  { %v2510_v17 = vpack.c.bf16 %v1497_v14, %v1494_v13 }
 0xcbb   :  { %2512 = vmatprep.subr.msk.bf16.mxu1 %vm2784_vm3, %v2510_v17 }
 0xcbc   :  { %2515 = vmatpush3.bf16.xpose.msk.msra.mxu1 %vm2784_vm3, %v2510_v17 }
 0xcbd   :  { %2517 = vmatprep.subr.bf16.mxu1 %v2516_v2 }
 0xcc3   :  { %2437 = vmatmul.mubr.msk.f32.vlgmr.msra.gmra.mrb[18].mxu1 %vm268_vm2, %v1440_v56 }
 0xcc4   :  { %2519 = vmatpush3.bf16.msra.mxu1 %v2516_v2 }
 0xcc5   :  { %2446 = vmatprep.subr.bf16.mxu1 %v2629_v16 }
 0xd96   :  { %v2438_v54 = vpop.f32.mrb[18].mxu1 }
 0xd97   :  { %v1641_v57 = vadd.f32 %v2438_v54, %v2801_v22  ;;  %v1635_v18 = vpop.f32.mrb[19].mxu1  ;;  %v1834_v54 = vsub.s32 2, %v2711_v26 }
 0xd98   :  { %v1636_v19 = vadd.f32 %v1635_v18, %v2806_v23  ;;  %v1840_v18 = vsub.s32 3, %v2711_v26 }
 0xd99   :  { %v1647_v20 = vsel %vm356_vm4, %v1641_v57, -inf }
 0xd9a   :  { %1648 = vmax.xlane.f32.xlu1 %v1647_v20  ;;  %v1644_v21 = vsel %vm356_vm4, %v1636_v19, -inf }
 0xd9b   :  { %1645 = vmax.xlane.f32.xlu0 %v1644_v21 }
 0xe27   :  { %v1649_v10 = vpop.xlane.xlu1 %1648 }
 0xe28   :  { %v1651_v24 = vsub.f32 %v1641_v57, %v1649_v10  ;;  %v1646_v25 = vpop.xlane.xlu0 %1645  ;;  %v1835_v57 = vrot.slane %v2717_v28, %v1834_v54 }
 0xe29   :  { %v1650_v27 = vsub.f32 %v1636_v19, %v1646_v25  ;;  %v1841_v25 = vrot.slane %v2717_v28, %v1840_v18 }
 0xe2a   :  { %v1654_v29 = vmul.f32 1.442695, %v1651_v24 }
 0xe2b   :  { %v1652_v30 = vmul.f32 1.442695, %v1650_v27 }
 0xe2c   :  { %2587 = vpow2.f32 %v1654_v29 }
 0xe2d   :  { %2589 = vpow2.f32 %v1652_v30 }
 0xe36   :  { %v2588_v31 = vpop.eup %2587 }
 0xe37   :  { %v2590_v32 = vpop.eup %2589  ;;  %v1659_v22 = vsel %vm356_vm4, %v2588_v31, 0.0 }
 0xe38   :  { %1660 = vadd.xlane.f32.xlu1 %v1659_v22  ;;  %v1656_v23 = vsel %vm356_vm4, %v2590_v32, 0.0  ;;  %v2552_v22 = vld [vmem:[%s3102_s5 + $0x8] sm:$0xff]  }
 0xe39   :  { %1657 = vadd.xlane.f32.xlu0 %v1656_v23  ;;  %v2553_v23 = vld [vmem:[%s3102_s5 + $0x10] sm:$0xff]  }
 0xec5   :  { %v1661_v33 = vpop.xlane.xlu1 %1660 }
 0xec6   :  { %2591 = vrcp.f32 %v1661_v33  ;;  %v1658_v34 = vpop.xlane.xlu0 %1657  ;;  %v2554_v33 = vld [vmem:[%s3102_s5 + $0x18] sm:$0xff]  }
 0xec7   :  { %2593 = vrcp.f32 %v1658_v34  ;;  %v2555_v34 = vld [vmem:[%s3102_s5 + $0x20] sm:$0xff]  }
 0xed0   :  { %v2592_v35 = vpop.eup %2591 }
 0xed1   :  { %v2594_v36 = vpop.eup %2593  ;;  %v1665_v38 = vmul.f32 %v2592_v35, %v2588_v31  ;;  %v2556_v35 = vld [vmem:[%s3102_s5 + $0x28] sm:$0xff]  }
 0xed2   :  { %v1664_v37 = vmul.f32 %v2594_v36, %v2590_v32  ;;  %v2551_v32 = vld [vmem:[%s3102_s5] sm:$0xff]   ;;  %v2557_v36 = vld [vmem:[%s3102_s5 + $0x30] sm:$0xff]  }
 0xed3   :  { %2461 = vmatpush3.bf16.msra.mxu0 %v2551_v32 }
 0xed4   :  { %2443 = vmatprep.mubr.msk.f32.mxu1 %vm356_vm4, %v1664_v37  ;;  %2462 = vmatprep.subr.bf16.mxu0 %v2629_v16  ;;  %v2558_v37 = vld [vmem:[%s3102_s5 + $0x38] sm:$0xff]   ;;  %s2631_s5 = smov [#allocation2]  }
 0xed5   :  { %2444 = vmatmul.mubr.msk.f32.vlgmr.msra.gmra.mrb[40].mxu1 %vm356_vm4, %v1665_v38  ;;  %v1851_v38 = vsub.s32 5, %v2711_v26  ;;  %s2046_s18 = sshll.u32 %s2631_s5, 4  ;;  %s2047_s18 = int_to_ptr.vmem [resolvable:$true] %s2046_s18 }
 0xed6   :  { %2448 = vmatprep.mubr.msk.bf16.mxu1 %vm2630_vm1, %v2629_v16  ;;  %2447 = vmatpush3.bf16.msra.mxu1 %v1753_v40  ;;  %s2605_s19 = scalar_lea.vmem %s2047_s18, 256  ;;  %p2610_p1 = scmp.lt.s32.totalorder %s2047_s18, %s2047_s18 }
 0xed7   :  { %2452 = vmatprep.subr.bf16.mxu1 %v2629_v16  ;;  %2463 = vmatpush3.bf16.msra.mxu0 %v2552_v22  ;;  %v1852_v39 = vrot.slane %v2717_v28, %v1851_v38  ;;  %p2606_p0 = scmp.ne.s32.totalorder %s2047_s18, %s2605_s19  ;;  %p2611_p2 = scmp.lt.s32.totalorder %s2605_s19, %s2605_s19 }
 0xed8   :  { %2464 = vmatprep.subr.bf16.mxu0 %v2629_v16 }
 0xed9   :  { %p2612_p3 = por %p2611_p2, %p2610_p1 }
 0xedb   :  { %2465 = vmatpush3.bf16.msra.mxu0 %v2553_v23  ;;  %p2613_p4 = pnand %p2612_p3, %p2606_p0 }
 0xedc   :  { %2466 = vmatprep.subr.bf16.mxu0 %v2629_v16 }
 0xedf   :  { %2467 = vmatpush3.bf16.msra.mxu0 %v2554_v33 }
 0xee0   :  { %2468 = vmatprep.subr.bf16.mxu0 %v2629_v16 }
 0xee3   :  { %2469 = vmatpush3.bf16.msra.mxu0 %v2555_v34 }
 0xee4   :  { %2470 = vmatprep.subr.bf16.mxu0 %v2629_v16 }
 0xee7   :  { %2471 = vmatpush3.bf16.msra.mxu0 %v2556_v35 }
 0xee8   :  { %2472 = vmatprep.subr.bf16.mxu0 %v2629_v16 }
 0xeeb   :  { %2473 = vmatpush3.bf16.msra.mxu0 %v2557_v36 }
 0xeec   :  { %2474 = vmatprep.subr.bf16.mxu0 %v2629_v16 }
 0xeef   :  { %2475 = vmatpush3.bf16.msra.mxu0 %v2558_v37 }
 0xfa8   :  { %v2445_v41 = vpop.f32.mrb[40].mxu1 }
 0xfa9   :  { %v1738_v43 = vpop.f32.mrb[41].mxu1 }
 0xfaa   :  { %v1748_v44 = vpack.c.bf16 %v2445_v41, %v1738_v43 }
 0xfac   :  { %2449 = vmatmul.mubr.msk.bf16.vlgmr.msra.gmra.mrb[44].mxu1 %vm268_vm2, %v1748_v44 }
 0xfad   :  { %2456 = vmatprep.mubr.msk.bf16.mxu1 %vm2630_vm1, %v2629_v16  ;;  %2453 = vmatpush3.bf16.msra.mxu1 %v2549_v9 }
 0xfae   :  { %2454 = vmatprep.subr.bf16.mxu1 %v2629_v16 }
 0xfb1   :  { %2455 = vmatpush3.bf16.msra.mxu1 %v2550_v7 }
0x107f   :  { %v1789_v46 = vpop.f32.mrb[44].mxu1 }
0x1080   :  { %v1796_v47 = vadd.f32 %v1789_v46, %v2980_v4  ;;  %v2450_v49 = vpop.f32.mrb[45].mxu1 }
0x1081   :  { %v1792_v50 = vpop.f32.mrb[46].mxu1 }
0x1082   :  { %v1798_v52 = vadd.f32 %v2603_v51, %v1796_v47  ;;  %v1797_v53 = vadd.f32 %v1792_v50, %v2983_v42  ;;  %v2451_v55 = vpop.f32.mrb[47].mxu1 }
0x1084   :  { %v3019_v56 = vadd.f32 %v1803_v48, %v1798_v52  ;;  %v1799_v59 = vadd.f32 %v2604_v58, %v1797_v53 }
0x1086   :  { %v3024_v60 = vadd.f32 %v1803_v48, %v1799_v59  ;;  %v1806_v61 = vsel %vm36_vm0, %v3019_v56, 0.0 }
0x1087   :  { %1807 = vadd.xlane.f32.xlu0 %v1806_v61 }
0x1088   :  { %v1809_v62 = vsel %vm36_vm0, %v3024_v60, 0.0 }
0x1089   :  { %1810 = vadd.xlane.f32.xlu1 %v1809_v62 }
0x1114   :  { %v1808_v63 = vpop.xlane.xlu0 %1807 }
0x1115   :  { %v1812_v0 = vmul.f32 0.03125, %v1808_v63 }
0x1116   :  { %v1811_v1 = vpop.xlane.xlu1 %1810 }
0x1117   :  { %v1814_v2 = vsub.f32 %v3019_v56, %v1812_v0  ;;  %v1813_v3 = vmul.f32 0.03125, %v1811_v1 }
0x1119   :  { %v1815_v4 = vsub.f32 %v3024_v60, %v1813_v3  ;;  %v1816_v5 = vmul.f32 %v1814_v2, %v1814_v2 }
0x111b   :  { %v1818_v6 = vsel %vm36_vm0, %v1816_v5, 0.0  ;;  %v1817_v42 = vmul.f32 %v1815_v4, %v1815_v4  ;;  %v1946_v5 = vsub.s32 6, %v2711_v26 }
0x111c   :  { %1819 = vadd.xlane.f32.xlu0 %v1818_v6 }
0x111d   :  { %v1821_v8 = vsel %vm36_vm0, %v1817_v42, 0.0  ;;  %v1947_v6 = vrot.slane %v2717_v28, %v1946_v5 }
0x111e   :  { %1822 = vadd.xlane.f32.xlu1 %v1821_v8 }
0x11a9   :  { %v1820_v11 = vpop.xlane.xlu0 %1819 }
0x11aa   :  { %v1824_v12 = vmul.f32 0.03125, %v1820_v11 }
0x11ab   :  { %v1823_v13 = vpop.xlane.xlu1 %1822 }
0x11ac   :  { %v1826_v14 = vadd.f32 1e-05, %v1824_v12  ;;  %v1825_v15 = vmul.f32 0.03125, %v1823_v13 }
0x11ae   :  { %2595 = vrsqrt.f32 %v1826_v14  ;;  %v1827_v17 = vadd.f32 1e-05, %v1825_v15 }
0x11b0   :  { %2597 = vrsqrt.f32 %v1827_v17 }
0x11b8   :  { %v2596_v19 = vpop.eup %2595 }
0x11b9   :  { %v1830_v20 = vmul.f32 %v2596_v19, %v1814_v2 }
0x11ba   :  { %v2598_v21 = vpop.eup %2597 }
0x11bb   :  { %v1836_v10 = vmul.f32 %v1835_v57, %v1830_v20  ;;  %v1831_v24 = vmul.f32 %v2598_v21, %v1815_v4 }
0x11bd   :  { %v1837_v27 = vmul.f32 %v1835_v57, %v1831_v24  ;;  %v1842_v29 = vadd.f32 %v1841_v25, %v1836_v10 }
0x11bf   :  { %v1843_v30 = vadd.f32 %v1841_v25, %v1837_v27 }
0x11c1   :  { %v1844_v31 = vpack.c.bf16 %v1843_v30, %v1842_v29 }
0x11c3   :  { %2457 = vmatmul.mubr.msk.bf16.vlgmr.msra.gmra.mrb[48].mxu1 %vm36_vm0, %v1844_v31 }
0x1296   :  { %v1902_v40 = vpop.f32.mrb[48].mxu1 }
0x1297   :  { %v1903_v41 = vadd.f32 %v1902_v40, %v1852_v39  ;;  %v2458_v43 = vpop.f32.mrb[49].mxu1 }
0x1298   :  { %v1905_v44 = vpop.f32.mrb[50].mxu1 }
0x1299   :  { %v1911_v45 = vmul.f32 0.044715, %v1903_v41  ;;  %v1906_v46 = vadd.f32 %v1905_v44, %v1852_v39  ;;  %v2459_v47 = vpop.f32.mrb[51].mxu1  ;;  %v1909_v63 = vmul.f32 0.5, %v1903_v41 }
0x129b   :  { %v1913_v48 = vmul.f32 %v1911_v45, %v1903_v41  ;;  %v1912_v49 = vmul.f32 0.044715, %v1906_v46  ;;  %v1910_v0 = vmul.f32 0.5, %v1906_v46 }
0x129d   :  { %v1915_v50 = vmul.f32 %v1913_v48, %v1903_v41  ;;  %v1914_v51 = vmul.f32 %v1912_v49, %v1906_v46 }
0x129f   :  { %v1917_v52 = vadd.f32 %v1915_v50, %v1903_v41  ;;  %v1916_v53 = vmul.f32 %v1914_v51, %v1906_v46 }
0x12a1   :  { %v1919_v55 = vmul.f32 0.7978846, %v1917_v52  ;;  %v1918_v16 = vadd.f32 %v1916_v53, %v1906_v46 }
0x12a3   :  { %2599 = vtanh.f32 %v1919_v55  ;;  %v1920_v58 = vmul.f32 0.7978846, %v1918_v16 }
0x12a5   :  { %2601 = vtanh.f32 %v1920_v58 }
0x12ad   :  { %v2600_v59 = vpop.eup %2599 }
0x12ae   :  { %v1923_v61 = vadd.f32 1.0, %v2600_v59 }
0x12af   :  { %v2602_v62 = vpop.eup %2601 }
0x12b0   :  { %v1924_v1 = vadd.f32 1.0, %v2602_v62  ;;  %v1925_v2 = vmul.f32 %v1923_v61, %v1909_v63 }
0x12b2   :  { %v1926_v3 = vmul.f32 %v1924_v1, %v1910_v0 }
0x12b4   :  { %v1927_v4 = vpack.c.bf16 %v1926_v3, %v1925_v2 }
0x12b6   :  { %2477 = vmatmul.mubr.bf16.vlgmr.msra.gmra.mrb[36].mxu0 %v1927_v4 }
0x1389   :  { %v2030_v42 = vpop.f32.mrb[36].mxu0 }
0x138a   :  { %v2031_v8 = vadd.f32 %v2030_v42, %v1947_v6  ;;  %v2478_v9 = vpop.f32.mrb[37].mxu0 }
0x138b   :  { %v2033_v7 = vpop.f32.mrb[38].mxu0 }
0x138c   :  { %v2037_v11 = vadd.f32 %v2031_v8, %v3019_v56  ;;  %v2034_v12 = vadd.f32 %v2033_v7, %v1947_v6  ;;  %v2479_v13 = vpop.f32.mrb[39].mxu0 }
0x138e   :  { %2039 = vst.msk [vmem:[#allocation2] sm:$0xff] %vm36_vm0, %v2037_v11  ;;  %v2038_v14 = vadd.f32 %v2034_v12, %v3024_v60 }
0x1390   :  { %2040 = vst.msk [vmem:[#allocation2 + $0x8] sm:$0xff] %vm36_vm0, %v2038_v14 }
0x1391   :  { %2616 = shalt.err (!%p2613_p4)
}
0x1392   :  { %s2617_s7 = scalar_lea.hbm %s3105_s8, 256 }
0x1393   :  { %p2618_p5 = scmp.ne.s32.totalorder %s3105_s8, %s2617_s7  ;;  %p2621_p6 = scmp.lt.u32.totalorder %s2617_s7, %s3105_s8 }
0x1395   :  { %p2623_p7 = pnand %p2621_p6, %p2618_p5 }
0x1397   :  { %2626 = shalt.err (!%p2623_p7)
}
0x1398   :  { %s2632_s0 = smov 128   ;;  %s2633_s23 = smov 8  }
0x1399   :  { %2052 = dma.vmem_to_hbm [thread:$0]  %s2047_s18, 256, %s3105_s8, [#allocation3], %s2632_s0, %s2632_s0, %s2633_s23  }
0x139a   :  { %2627 = dma.done.wait [#allocation3], 256  }
0x139b   :  { %2628 = vsyncadd [#allocation3], 4294967040 }
0x139c   :  { %2056 = vsyncpa [#allocation3], 1 }

</bundles_post_ra>
